<compile_context>
chip_gen: v7x
topology: tpu7x:2x2x1
jax: 0.10.0
libtpu: 0.0.40
codegen_flags: <defaults>
</compile_context>

<pallas_src>
import jax
import jax.numpy as jnp
from jax.experimental import pallas as pl
from jax.experimental.pallas import tpu as pltpu

# Logical (PyTorch) dims; hidden/output dims lane-padded, input K left at 784.
D_IN, D_H1_RAW, D_H2_RAW, D_OUT_RAW = 784, 1000, 100, 10
D_H1, D_H2, D_OUT = 1024, 128, 128

TILE_B = 1024          # large-batch tile (fits all of v5e/v6e/v7x VMEM budgets)
NEG_BIG = -1e30        # masks padded logit lanes via the folded bias


def _round_up(n, m):
    return ((n + m - 1) // m) * m


def _choose_tile_b(batch):
    """Batch tile: multiple of 16 (bf16 sublane packing); >=2 grid steps whenever
    the batch allows it so v7x's two TensorCores both get work."""
    b16 = _round_up(batch, 16)
    if b16 <= 16:
        return 16
    if b16 >= 2 * TILE_B:
        return TILE_B
    return _round_up((b16 + 1) // 2, 16)


def mlp_kernel(x_ref, w1_ref, b1_ref, w2_ref, b2_ref, w3_ref, b3_ref, o_ref):
    # In-kernel bf16 cast of the f32 input tile (VPU filler under MXU slack).
    x = x_ref[...].astype(jnp.bfloat16)                       # (tile_b, 784)

    # ---- Linear(784 -> 1000) + ReLU : bf16 MXU matmul, f32 accumulation ----
    h1 = jnp.dot(x, w1_ref[...], preferred_element_type=jnp.float32)
    h1 = jnp.maximum(h1 + b1_ref[...], 0.0).astype(jnp.bfloat16)   # (tile_b, 1024)

    # ---- Linear(1000 -> 100) + ReLU ----
    h2 = jnp.dot(h1, w2_ref[...], preferred_element_type=jnp.float32)
    h2 = jnp.maximum(h2 + b2_ref[...], 0.0).astype(jnp.bfloat16)   # (tile_b, 128)

    # ---- Linear(100 -> 10) ; padded lanes 10..127 get -1e30 from the bias ----
    logits = jnp.dot(h2, w3_ref[...], preferred_element_type=jnp.float32)
    logits = logits + b3_ref[...]                                   # (tile_b, 128)

    # ---- Numerically stable softmax over dim=1 (f32 math) ----
    m = jnp.max(logits, axis=-1, keepdims=True)
    e = jnp.exp(logits - m)
    denom = jnp.sum(e, axis=-1, keepdims=True)
    o_ref[...] = e * pl.reciprocal(denom, approx=True)       # EUP vrcp (free slot)


def prepare_params(params):
    """Zero-pad N dims to lane multiples; weights bf16 (MXU-native), biases f32.
    The last bias carries -1e30 on padded lanes so padded logits are masked."""
    w1, b1, w2, b2, w3, b3 = params

    def pad2(a, r, c):
        return jnp.pad(a, ((0, r - a.shape[0]), (0, c - a.shape[1])))

    w1p = pad2(w1, D_IN, D_H1).astype(jnp.bfloat16)    # K stays 784
    w2p = pad2(w2, D_H1, D_H2).astype(jnp.bfloat16)
    w3p = pad2(w3, D_H2, D_OUT).astype(jnp.bfloat16)
    b1p = pad2(b1, 1, D_H1)                            # padded lanes 0 -> ReLU keeps 0
    b2p = pad2(b2, 1, D_H2)
    b3p = jnp.full((1, D_OUT), NEG_BIG, jnp.float32).at[:, :D_OUT_RAW].set(b3[0])
    return (w1p, b1p, w2p, b2p, w3p, b3p)


def mlp_forward(x_nchw, packed_params):
    """x_nchw: (B, 1, 28, 28) float32 -> (B, 10) float32 softmax probabilities."""
    w1, b1, w2, b2, w3, b3 = packed_params
    B = x_nchw.shape[0]
    x = x_nchw.reshape(B, -1).astype(jnp.float32)             # nn.Flatten() (glue)

    tile_b = _choose_tile_b(B)
    b_pad = _round_up(B, tile_b)
    if b_pad != B:
        x = jnp.pad(x, ((0, b_pad - B), (0, 0)))              # pad batch rows only

    def resident(arr):
        # Constant index_map: weight/bias block fetched once, stays in VMEM.
        shape = arr.shape
        return pl.BlockSpec(shape, lambda i: (0,) * len(shape))

    out = pl.pallas_call(
        mlp_kernel,
        out_shape=jax.ShapeDtypeStruct((b_pad, D_OUT), jnp.float32),
        grid=(b_pad // tile_b,),
        in_specs=[
            # f32 input, last block dim == full array dim (784) -> legal & unpadded.
            pl.BlockSpec((tile_b, D_IN), lambda i: (i, 0)),
            resident(w1), resident(b1),
            resident(w2), resident(b2),
            resident(w3), resident(b3),
        ],
        out_specs=pl.BlockSpec((tile_b, D_OUT), lambda i: (i, 0)),
        compiler_params=pltpu.CompilerParams(
            dimension_semantics=("parallel",),
            vmem_limit_bytes=48 * 1024 * 1024,
        ),
    )(x, w1, b1, w2, b2, w3, b3)

    return out[:B, :D_OUT_RAW]


def init_params(key):
    """PyTorch-default Linear init: uniform(-1/sqrt(fan_in), 1/sqrt(fan_in)).
    Weights stored (in_features, out_features) so matmuls are x @ W + b."""
    def linear(key, fan_in, fan_out):
        kw, kb = jax.random.split(key)
        bound = 1.0 / jnp.sqrt(float(fan_in))
        w = jax.random.uniform(kw, (fan_in, fan_out), jnp.float32, -bound, bound)
        b = jax.random.uniform(kb, (1, fan_out), jnp.float32, -bound, bound)
        return w, b

    k1, k2, k3 = jax.random.split(key, 3)
    w1, b1 = linear(k1, D_IN, D_H1_RAW)
    w2, b2 = linear(k2, D_H1_RAW, D_H2_RAW)
    w3, b3 = linear(k3, D_H2_RAW, D_OUT_RAW)
    return (w1, b1, w2, b2, w3, b3)


def mlp_reference(x_nchw, params):
    """Pure-JAX f32 reference (matches the PyTorch forward)."""
    w1, b1, w2, b2, w3, b3 = params
    x = x_nchw.reshape(x_nchw.shape[0], -1)
    h1 = jnp.maximum(x @ w1 + b1, 0.0)
    h2 = jnp.maximum(h1 @ w2 + b2, 0.0)
    return jax.nn.softmax(h2 @ w3 + b3, axis=1)


if __name__ == "__main__":
    key = jax.random.PRNGKey(0)
    k_param, k_x = jax.random.split(key)

    params = init_params(k_param)
    packed = prepare_params(params)

    # MNIST-like input: batch=2, NCHW (2, 1, 28, 28) so Flatten gives 784.
    x = jax.random.normal(k_x, (2, 1, 28, 28), dtype=jnp.float32)

    out = mlp_forward(x, packed)
    out = jax.block_until_ready(out)

    # Sanity: shape, softmax rows ~1 (approx reciprocal), agreement with f32 ref
    # (bf16 matmuls -> loose tolerance, intentional precision choice).
    assert out.shape == (2, 10)
    assert jnp.allclose(jnp.sum(out, axis=1), 1.0, atol=1e-2)
    ref = mlp_reference(x, params)
    assert jnp.max(jnp.abs(out - ref)) < 0.1

    print("KERNEL_OK")
</pallas_src>

<mosaic_0001>
module attributes {stable_mosaic.version = 11 : i64} {
  func.func @mlp_kernel(%arg0: i32, %arg1: memref<16x784xf32, #tpu.memory_space<vmem>>, %arg2: memref<784x1024xbf16, #tpu.memory_space<vmem>>, %arg3: memref<1x1024xf32, #tpu.memory_space<vmem>>, %arg4: memref<1024x128xbf16, #tpu.memory_space<vmem>>, %arg5: memref<1x128xf32, #tpu.memory_space<vmem>>, %arg6: memref<128x128xbf16, #tpu.memory_space<vmem>>, %arg7: memref<1x128xf32, #tpu.memory_space<vmem>>, %arg8: memref<16x128xf32, #tpu.memory_space<vmem>>) attributes {dimension_semantics = [#tpu.dimension_semantics<parallel>], iteration_bounds = array<i64: 1>, scalar_prefetch = 0 : i64, scratch_operands = 0 : i64, tpu.core_type = #tpu.core_type<tc>, window_params = [{transform_indices = @transform_0, window_bounds = array<i64: 16, 784>}, {pipeline_mode = #tpu.pipeline_mode<synchronous>, transform_indices = @transform_1, window_bounds = array<i64: 784, 1024>}, {pipeline_mode = #tpu.pipeline_mode<synchronous>, transform_indices = @transform_2, window_bounds = array<i64: 1, 1024>}, {pipeline_mode = #tpu.pipeline_mode<synchronous>, transform_indices = @transform_3, window_bounds = array<i64: 1024, 128>}, {pipeline_mode = #tpu.pipeline_mode<synchronous>, transform_indices = @transform_4, window_bounds = array<i64: 1, 128>}, {pipeline_mode = #tpu.pipeline_mode<synchronous>, transform_indices = @transform_5, window_bounds = array<i64: 128, 128>}, {pipeline_mode = #tpu.pipeline_mode<synchronous>, transform_indices = @transform_6, window_bounds = array<i64: 1, 128>}, {transform_indices = @transform_7, window_bounds = array<i64: 16, 128>}]} {
    %c0 = arith.constant 0 : index
    %c0_0 = arith.constant 0 : index
    %0 = vector.load %arg1[%c0, %c0_0] : memref<16x784xf32, #tpu.memory_space<vmem>>, vector<16x784xf32>
    %1 = arith.truncf %0 : vector<16x784xf32> to vector<16x784xbf16>
    %c0_1 = arith.constant 0 : index
    %c0_2 = arith.constant 0 : index
    %2 = vector.load %arg2[%c0_1, %c0_2] : memref<784x1024xbf16, #tpu.memory_space<vmem>>, vector<784x1024xbf16>
    %cst = arith.constant dense<0.000000e+00> : vector<16x1024xf32>
    %3 = tpu.matmul %1, %2, %cst {dimension_numbers = #tpu.dot_dimension_numbers<[1], [0], [0], [1], [0, 0, 1, 1], [], []>} : vector<16x784xbf16>, vector<784x1024xbf16>, vector<16x1024xf32> -> vector<16x1024xf32>
    %c0_3 = arith.constant 0 : index
    %c0_4 = arith.constant 0 : index
    %4 = vector.load %arg3[%c0_3, %c0_4] : memref<1x1024xf32, #tpu.memory_space<vmem>>, vector<1x1024xf32>
    %5 = vector.broadcast %4 : vector<1x1024xf32> to vector<16x1024xf32>
    %6 = arith.addf %3, %5 : vector<16x1024xf32>
    %cst_5 = arith.constant 0.000000e+00 : f32
    %7 = vector.broadcast %cst_5 : f32 to vector<16x1024xf32>
    %8 = arith.maximumf %6, %7 : vector<16x1024xf32>
    %9 = arith.truncf %8 : vector<16x1024xf32> to vector<16x1024xbf16>
    %c0_6 = arith.constant 0 : index
    %c0_7 = arith.constant 0 : index
    %10 = vector.load %arg4[%c0_6, %c0_7] : memref<1024x128xbf16, #tpu.memory_space<vmem>>, vector<1024x128xbf16>
    %cst_8 = arith.constant dense<0.000000e+00> : vector<16x128xf32>
    %11 = tpu.matmul %9, %10, %cst_8 {dimension_numbers = #tpu.dot_dimension_numbers<[1], [0], [0], [1], [0, 0, 1, 1], [], []>} : vector<16x1024xbf16>, vector<1024x128xbf16>, vector<16x128xf32> -> vector<16x128xf32>
    %c0_9 = arith.constant 0 : index
    %c0_10 = arith.constant 0 : index
    %12 = vector.load %arg5[%c0_9, %c0_10] : memref<1x128xf32, #tpu.memory_space<vmem>>, vector<1x128xf32>
    %13 = vector.broadcast %12 : vector<1x128xf32> to vector<16x128xf32>
    %14 = arith.addf %11, %13 : vector<16x128xf32>
    %cst_11 = arith.constant 0.000000e+00 : f32
    %15 = vector.broadcast %cst_11 : f32 to vector<16x128xf32>
    %16 = arith.maximumf %14, %15 : vector<16x128xf32>
    %17 = arith.truncf %16 : vector<16x128xf32> to vector<16x128xbf16>
    %c0_12 = arith.constant 0 : index
    %c0_13 = arith.constant 0 : index
    %18 = vector.load %arg6[%c0_12, %c0_13] : memref<128x128xbf16, #tpu.memory_space<vmem>>, vector<128x128xbf16>
    %cst_14 = arith.constant dense<0.000000e+00> : vector<16x128xf32>
    %19 = tpu.matmul %17, %18, %cst_14 {dimension_numbers = #tpu.dot_dimension_numbers<[1], [0], [0], [1], [0, 0, 1, 1], [], []>} : vector<16x128xbf16>, vector<128x128xbf16>, vector<16x128xf32> -> vector<16x128xf32>
    %c0_15 = arith.constant 0 : index
    %c0_16 = arith.constant 0 : index
    %20 = vector.load %arg7[%c0_15, %c0_16] : memref<1x128xf32, #tpu.memory_space<vmem>>, vector<1x128xf32>
    %21 = vector.broadcast %20 : vector<1x128xf32> to vector<16x128xf32>
    %22 = arith.addf %19, %21 : vector<16x128xf32>
    %cst_17 = arith.constant dense<0xFF800000> : vector<16xf32>
    %23 = vector.multi_reduction <maximumf>, %22, %cst_17 [1] : vector<16x128xf32> to vector<16xf32>
    %24 = vector.shape_cast %23 : vector<16xf32> to vector<16x1xf32>
    %25 = vector.broadcast %24 : vector<16x1xf32> to vector<16x128xf32>
    %26 = arith.subf %22, %25 : vector<16x128xf32>
    %27 = math.exp %26 : vector<16x128xf32>
    %cst_18 = arith.constant dense<0.000000e+00> : vector<16xf32>
    %28 = vector.multi_reduction <add>, %27, %cst_18 [1] : vector<16x128xf32> to vector<16xf32>
    %29 = vector.shape_cast %28 : vector<16xf32> to vector<16x1xf32>
    %30 = tpu.reciprocal %29 {approx = true} : vector<16x1xf32> -> vector<16x1xf32>
    %31 = vector.broadcast %30 : vector<16x1xf32> to vector<16x128xf32>
    %32 = arith.mulf %27, %31 : vector<16x128xf32>
    %c0_19 = arith.constant 0 : index
    %c0_20 = arith.constant 0 : index
    %33 = vector.load %arg8[%c0_19, %c0_20] : memref<16x128xf32, #tpu.memory_space<vmem>>, vector<16x128xf32>
    tpu.vector_store %arg8[%c0_19, %c0_20], %32 {strides = array<i32>} : memref<16x128xf32, #tpu.memory_space<vmem>>, vector<16x128xf32>,
    return
  }
  func.func @transform_0(%arg0: i32) -> (i32, i32) {
    %c0_i32 = arith.constant 0 : i32
    %c0_i32_0 = arith.constant 0 : i32
    return %arg0, %c0_i32 : i32, i32
  }
  func.func @transform_1(%arg0: i32) -> (i32, i32) {
    %c0_i32 = arith.constant 0 : i32
    %c0_i32_0 = arith.constant 0 : i32
    %c0_i32_1 = arith.constant 0 : i32
    return %c0_i32, %c0_i32_0 : i32, i32
  }
  func.func @transform_2(%arg0: i32) -> (i32, i32) {
    %c0_i32 = arith.constant 0 : i32
    %c0_i32_0 = arith.constant 0 : i32
    %c0_i32_1 = arith.constant 0 : i32
    return %c0_i32, %c0_i32_0 : i32, i32
  }
  func.func @transform_3(%arg0: i32) -> (i32, i32) {
    %c0_i32 = arith.constant 0 : i32
    %c0_i32_0 = arith.constant 0 : i32
    %c0_i32_1 = arith.constant 0 : i32
    return %c0_i32, %c0_i32_0 : i32, i32
  }
  func.func @transform_4(%arg0: i32) -> (i32, i32) {
    %c0_i32 = arith.constant 0 : i32
    %c0_i32_0 = arith.constant 0 : i32
    %c0_i32_1 = arith.constant 0 : i32
    return %c0_i32, %c0_i32_0 : i32, i32
  }
  func.func @transform_5(%arg0: i32) -> (i32, i32) {
    %c0_i32 = arith.constant 0 : i32
    %c0_i32_0 = arith.constant 0 : i32
    %c0_i32_1 = arith.constant 0 : i32
    return %c0_i32, %c0_i32_0 : i32, i32
  }
  func.func @transform_6(%arg0: i32) -> (i32, i32) {
    %c0_i32 = arith.constant 0 : i32
    %c0_i32_0 = arith.constant 0 : i32
    %c0_i32_1 = arith.constant 0 : i32
    return %c0_i32, %c0_i32_0 : i32, i32
  }
  func.func @transform_7(%arg0: i32) -> (i32, i32) {
    %c0_i32 = arith.constant 0 : i32
    %c0_i32_0 = arith.constant 0 : i32
    return %arg0, %c0_i32 : i32, i32
  }
}

</mosaic_0001>

<bundles_post_ra>
// kernel: tpu_custom_call.1
= control target key start
LH: loop header
LB: loop body
LE: loop exit
PB: predicated region body
PF: predicated region fallthrough
CT: control target
= control target key end

     0   :  { %12 = vsyncpa [#allocation3], 0  ;;  %s5278_s0 = inlined_call_operand.hbm [shape: f32[16,784], index: 0, kind: input, shape index: {}]   ;;  %s5279_s1 = inlined_call_operand.hbm [shape: bf16[784,1024], index: 1, kind: input, shape index: {}]   ;;  %s5280_s2 = inlined_call_operand.hbm [shape: f32[1,1024], index: 2, kind: input, shape index: {}]   ;;  %s5281_s3 = inlined_call_operand.hbm [shape: bf16[1024,128], index: 3, kind: input, shape index: {}]   ;;  %s5282_s4 = inlined_call_operand.hbm [shape: f32[1,128], index: 4, kind: input, shape index: {}]   ;;  %s5283_s5 = inlined_call_operand.hbm [shape: bf16[128,128], index: 5, kind: input, shape index: {}]   ;;  %s5284_s6 = inlined_call_operand.hbm [shape: f32[1,128], index: 6, kind: input, shape index: {}]   ;;  %s5285_s7 = inlined_call_operand.hbm [shape: f32[16,128], index: 7, kind: output, shape index: {}]  }
   0x1   :  { %13 = vsyncpa [#allocation6], 0 }
   0x2   :  { %14 = vsyncpa [#allocation9], 0 }
   0x3   :  { %15 = vsyncpa [#allocation12], 0 }
   0x4   :  { %16 = vsyncpa [#allocation4], 0  ;;  %s5022_s24 = smov [#allocation5]   ;;  %s4836_s28 = scalar_lea.hbm %s5279_s1, 50176 }
   0x5   :  { %s34_s25 = sshll.u32 %s5022_s24, 4  ;;  %p4837_p0 = scmp.ne.s32.totalorder %s5279_s1, %s4836_s28  ;;  %s35_s25 = int_to_ptr.vmem [resolvable:$true] %s34_s25 }
   0x6   :  { %p4840_p1 = scmp.lt.u32.totalorder %s4836_s28, %s5279_s1 }
   0x8   :  { %p4842_p2 = pnand %p4840_p1, %p4837_p0 }
   0xa   :  { %4845 = shalt.err (!%p4842_p2)
}
   0xb   :  { %s4846_s10 = scalar_lea.vmem %s35_s25, 50176  ;;  %p4851_p4 = scmp.lt.s32.totalorder %s35_s25, %s35_s25 }
   0xc   :  { %p4847_p3 = scmp.ne.s32.totalorder %s35_s25, %s4846_s10  ;;  %p4852_p5 = scmp.lt.s32.totalorder %s4846_s10, %s4846_s10 }
   0xe   :  { %p4853_p6 = por %p4852_p5, %p4851_p4 }
  0x10   :  { %p4854_p7 = pnand %p4853_p6, %p4847_p3 }
  0x12   :  { %4857 = shalt.err (!%p4854_p7)
}
  0x13   :  { %s5023_s11 = smov 512   ;;  %s5024_s12 = smov 32  }
  0x14   :  { %40 = dma.hbm_to_vmem [thread:$0]  %s5279_s1, 50176, %s35_s25, [#allocation6], %s5023_s11, %s5023_s11, %s5024_s12  }
  0x15   :  { %s5025_s15 = smov [#allocation8]   ;;  %s4858_s19 = scalar_lea.hbm %s5281_s3, 8192 }
  0x16   :  { %s56_s16 = sshll.u32 %s5025_s15, 4  ;;  %p4859_p8 = scmp.ne.s32.totalorder %s5281_s3, %s4858_s19  ;;  %s57_s16 = int_to_ptr.vmem [resolvable:$true] %s56_s16 }
  0x17   :  { %p4862_p9 = scmp.lt.u32.totalorder %s4858_s19, %s5281_s3 }
  0x19   :  { %p4864_p10 = pnand %p4862_p9, %p4859_p8 }
  0x1b   :  { %4867 = shalt.err (!%p4864_p10)
}
  0x1c   :  { %s4868_s24 = scalar_lea.vmem %s57_s16, 8192  ;;  %p4873_p12 = scmp.lt.s32.totalorder %s57_s16, %s57_s16 }
  0x1d   :  { %p4869_p11 = scmp.ne.s32.totalorder %s57_s16, %s4868_s24  ;;  %p4874_p13 = scmp.lt.s32.totalorder %s4868_s24, %s4868_s24 }
  0x1f   :  { %p4875_p0 = por %p4874_p13, %p4873_p12 }
  0x21   :  { %p4876_p1 = pnand %p4875_p0, %p4869_p11 }
  0x23   :  { %4879 = shalt.err (!%p4876_p1)
}
  0x24   :  { %s5026_s1 = smov 64   ;;  %s5027_s25 = smov 4  }
  0x25   :  { %62 = dma.hbm_to_vmem [thread:$0]  %s5281_s3, 8192, %s57_s16, [#allocation9], %s5026_s1, %s5026_s1, %s5027_s25  }
  0x26   :  { %s5028_s28 = smov [#allocation11]   ;;  %s5029_s30 = smov [#allocation2]  }
  0x27   :  { %s78_s29 = sshll.u32 %s5028_s28, 4  ;;  %s22_s8 = sshll.u32 %s5029_s30, 4  ;;  %s79_s29 = int_to_ptr.vmem [resolvable:$true] %s78_s29  ;;  %s5105_s8 = int_to_ptr.vmem [resolvable:$true] %s22_s8 }
  0x28   :  { %s4880_s11 = scalar_lea.hbm %s5283_s5, 1024 }
  0x29   :  { %p4881_p2 = scmp.ne.s32.totalorder %s5283_s5, %s4880_s11  ;;  %p4884_p3 = scmp.lt.u32.totalorder %s4880_s11, %s5283_s5 }
  0x2b   :  { %p4886_p4 = pnand %p4884_p3, %p4881_p2 }
  0x2d   :  { %4889 = shalt.err (!%p4886_p4)
}
  0x2e   :  { %s4890_s3 = scalar_lea.vmem %s79_s29, 1024  ;;  %p4895_p6 = scmp.lt.s32.totalorder %s79_s29, %s79_s29 }
  0x2f   :  { %p4891_p5 = scmp.ne.s32.totalorder %s79_s29, %s4890_s3  ;;  %p4896_p7 = scmp.lt.s32.totalorder %s4890_s3, %s4890_s3 }
  0x31   :  { %p4897_p8 = por %p4896_p7, %p4895_p6 }
  0x33   :  { %p4898_p9 = pnand %p4897_p8, %p4891_p5 }
  0x35   :  { %4901 = shalt.err (!%p4898_p9)
}
  0x36   :  { %84 = dma.hbm_to_vmem [thread:$0]  %s5283_s5, 1024, %s79_s29, [#allocation12], %s5026_s1, %s5026_s1, %s5027_s25  }
  0x37   :  { %s4902_s20 = scalar_lea.hbm %s5278_s0, 1792 }
  0x38   :  { %p4903_p10 = scmp.ne.s32.totalorder %s5278_s0, %s4902_s20  ;;  %p4906_p11 = scmp.lt.u32.totalorder %s4902_s20, %s5278_s0 }
  0x3a   :  { %p4908_p12 = pnand %p4906_p11, %p4903_p10 }
  0x3c   :  { %4911 = shalt.err (!%p4908_p12)
}
  0x3d   :  { %s4912_s26 = scalar_lea.vmem %s5105_s8, 1792  ;;  %p4917_p0 = scmp.lt.s32.totalorder %s5105_s8, %s5105_s8 }
  0x3e   :  { %p4913_p13 = scmp.ne.s32.totalorder %s5105_s8, %s4912_s26  ;;  %p4918_p1 = scmp.lt.s32.totalorder %s4912_s26, %s4912_s26 }
  0x40   :  { %p4919_p2 = por %p4918_p1, %p4917_p0 }
  0x42   :  { %p4920_p3 = pnand %p4919_p2, %p4913_p13 }
  0x44   :  { %4923 = shalt.err (!%p4920_p3)
}
  0x45   :  { %s5030_s5 = smov 896   ;;  %s5031_s1 = smov 56  }
  0x46   :  { %28 = dma.hbm_to_vmem [thread:$0]  %s5278_s0, 1792, %s5105_s8, [#allocation3], %s5030_s5, %s5030_s5, %s5031_s1  }
  0x47   :  { %s5032_s28 = smov [#allocation7]   ;;  %s5033_s30 = smov [#allocation10]  }
  0x48   :  { %s47_s29 = sshll.u32 %s5032_s28, 4  ;;  %s69_s9 = sshll.u32 %s5033_s30, 4  ;;  %s48_s29 = int_to_ptr.vmem [resolvable:$true] %s47_s29  ;;  %s70_s9 = int_to_ptr.vmem [resolvable:$true] %s69_s9 }
  0x49   :  { %s4924_s12 = scalar_lea.hbm %s5280_s2, 128 }
  0x4a   :  { %p4925_p4 = scmp.ne.s32.totalorder %s5280_s2, %s4924_s12  ;;  %p4928_p5 = scmp.lt.u32.totalorder %s4924_s12, %s5280_s2 }
  0x4c   :  { %p4930_p6 = pnand %p4928_p5, %p4925_p4 }
  0x4e   :  { %4933 = shalt.err (!%p4930_p6)
}
  0x4f   :  { %s4934_s0 = scalar_lea.vmem %s48_s29, 128  ;;  %p4939_p8 = scmp.lt.s32.totalorder %s48_s29, %s48_s29 }
  0x50   :  { %p4935_p7 = scmp.ne.s32.totalorder %s48_s29, %s4934_s0  ;;  %p4940_p9 = scmp.lt.s32.totalorder %s4934_s0, %s4934_s0 }
  0x52   :  { %p4941_p10 = por %p4940_p9, %p4939_p8 }
  0x54   :  { %p4942_p11 = pnand %p4941_p10, %p4935_p7 }
  0x56   :  { %4945 = shalt.err (!%p4942_p11)
}
  0x57   :  { %50 = dma.hbm_to_vmem [thread:$0]  %s5280_s2, 128, %s48_s29, [#allocation6]  }
  0x58   :  { %s4946_s19 = scalar_lea.hbm %s5282_s4, 16 }
  0x59   :  { %p4947_p12 = scmp.ne.s32.totalorder %s5282_s4, %s4946_s19  ;;  %p4950_p13 = scmp.lt.u32.totalorder %s4946_s19, %s5282_s4 }
  0x5b   :  { %p4952_p0 = pnand %p4950_p13, %p4947_p12 }
  0x5d   :  { %4955 = shalt.err (!%p4952_p0)
}
  0x5e   :  { %s4956_s24 = scalar_lea.vmem %s70_s9, 16  ;;  %s4960_s26 = scalar_lea.vmem %s70_s9, 32 }
  0x5f   :  { %p4957_p1 = scmp.ne.s32.totalorder %s70_s9, %s4956_s24  ;;  %p4961_p2 = scmp.lt.s32.totalorder %s70_s9, %s70_s9 }
  0x60   :  { %p4962_p3 = scmp.lt.s32.totalorder %s4960_s26, %s4956_s24 }
  0x62   :  { %p4963_p4 = por %p4962_p3, %p4961_p2 }
  0x64   :  { %p4964_p5 = pnand %p4963_p4, %p4957_p1 }
  0x66   :  { %4967 = shalt.err (!%p4964_p5)
}
  0x67   :  { %72 = dma.hbm_to_vmem [thread:$0]  %s5282_s4, 16, %s70_s9, [#allocation9]  }
  0x68   :  { %s5034_s1 = smov [#allocation13]   ;;  %s4968_s29 = scalar_lea.hbm %s5284_s6, 16 }
  0x69   :  { %s91_s25 = sshll.u32 %s5034_s1, 4  ;;  %p4969_p6 = scmp.ne.s32.totalorder %s5284_s6, %s4968_s29  ;;  %s92_s25 = int_to_ptr.vmem [resolvable:$true] %s91_s25 }
  0x6a   :  { %p4972_p7 = scmp.lt.u32.totalorder %s4968_s29, %s5284_s6 }
  0x6c   :  { %p4974_p8 = pnand %p4972_p7, %p4969_p6 }
  0x6e   :  { %4977 = shalt.err (!%p4974_p8)
}
  0x6f   :  { %s4978_s13 = scalar_lea.vmem %s92_s25, 16  ;;  %s4982_s4 = scalar_lea.vmem %s92_s25, 32 }
  0x70   :  { %p4979_p9 = scmp.ne.s32.totalorder %s92_s25, %s4978_s13  ;;  %p4983_p10 = scmp.lt.s32.totalorder %s92_s25, %s92_s25 }
  0x71   :  { %p4984_p11 = scmp.lt.s32.totalorder %s4982_s4, %s4978_s13 }
  0x73   :  { %p4985_p12 = por %p4984_p11, %p4983_p10 }
  0x75   :  { %p4986_p13 = pnand %p4985_p12, %p4979_p9 }
  0x77   :  { %4989 = shalt.err (!%p4986_p13)
}
  0x78   :  { %94 = dma.hbm_to_vmem [thread:$0]  %s5284_s6, 16, %s92_s25, [#allocation12]  }
  0x79   :  { %5012 = dma.done.wait [#allocation3], 1792  }
  0x7a   :  { %5013 = vsyncadd [#allocation3], 4294965504 }
  0x7b   :  { %5014 = dma.done.wait [#allocation6], 50304  }
  0x7c   :  { %5015 = vsyncadd [#allocation6], 4294916992 }
  0x7d   :  { %5016 = dma.done.wait [#allocation9], 8208  }
  0x7e   :  { %5017 = vsyncadd [#allocation9], 4294959088 }
  0x7f   :  { %5018 = dma.done.wait [#allocation12], 1040  }
  0x80   :  { %5019 = vsyncadd [#allocation12], 4294966256  ;;  %v5035_v0 = vmov 0   ;;  %v138_v1 = vld [vmem:[#allocation5] sm:$0xff]  ;;  %v130_v13 = vld [vmem:[#allocation2 + $0x68] sm:$0xff]  ;;  %vm2532_vm0 = vcmask 130048  }
  0x81   :  { %2697 = vmatprep.mubr.bf16.mxu1 %v5035_v0  ;;  %v142_v2 = vld [vmem:[#allocation5 + $0x20] sm:$0xff]  ;;  %v139_v14 = vld [vmem:[#allocation5 + $0x8] sm:$0xff]  ;;  %v118_v60 = vld [vmem:[#allocation2 + $0x8] sm:$0xff]  ;;  %vm5037_vm1 = vmmov 0   ;;  %s5038_s6 = smov [#allocation14]  }
  0x82   :  { %v522_v3 = vld [vmem:[#allocation5 + $0xc00] sm:$0xff]  ;;  %v4087_v4 = vcombine.high %v138_v1, %v142_v2  ;;  %v4086_v6 = vcombine.low %v138_v1, %v142_v2  ;;  %v143_v15 = vld [vmem:[#allocation5 + $0x28] sm:$0xff]  ;;  %v125_v61 = vld [vmem:[#allocation2 + $0x40] sm:$0xff]  ;;  %s4071_s15 = sshll.u32 %s5038_s6, 4  ;;  %s4072_s15 = int_to_ptr.vmem [resolvable:$true] %s4071_s15 }
  0x83   :  { %v526_v5 = vld [vmem:[#allocation5 + $0xc20] sm:$0xff]  ;;  %v4089_v19 = vcombine.high %v139_v14, %v143_v15  ;;  %v147_v21 = vld [vmem:[#allocation5 + $0x48] sm:$0xff]  ;;  %v4088_v23 = vcombine.low %v139_v14, %v143_v15  ;;  %v5177_v1 = vpack.c.bf16 %v125_v61, %v118_v60  ;;  %s4990_s3 = scalar_lea.vmem %s4072_s15, 256  ;;  %p4995_p1 = scmp.lt.s32.totalorder %s4072_s15, %s4072_s15 }
  0x84   :  { %v146_v7 = vld [vmem:[#allocation5 + $0x40] sm:$0xff]  ;;  %v4471_v9 = vcombine.high %v522_v3, %v526_v5  ;;  %v4470_v10 = vcombine.low %v522_v3, %v526_v5  ;;  %2536 = vmatprep.subr.bf16.mxu0 %v4087_v4  ;;  %v151_v22 = vld [vmem:[#allocation5 + $0x68] sm:$0xff]  ;;  %p4991_p0 = scmp.ne.s32.totalorder %s4072_s15, %s4990_s3  ;;  %p4996_p2 = scmp.lt.s32.totalorder %s4990_s3, %s4990_s3 }
  0x85   :  { %v150_v8 = vld [vmem:[#allocation5 + $0x60] sm:$0xff]  ;;  %2537 = vmatpush1.bf16.msra.mxu0 %v4086_v6  ;;  %v4097_v25 = vcombine.high %v147_v21, %v151_v22  ;;  %v155_v28 = vld [vmem:[#allocation5 + $0x88] sm:$0xff]  ;;  %v4096_v31 = vcombine.low %v147_v21, %v151_v22  ;;  %2568 = vmatprep.mubr.bf16.mxu0 %v5177_v1 }
  0x86   :  { %v4095_v11 = vcombine.high %v146_v7, %v150_v8  ;;  %v123_v12 = vld [vmem:[#allocation2 + $0x30] sm:$0xff]  ;;  %2665 = vmatprep.subr.bf16.mxu1 %v4471_v9  ;;  %v4094_v20 = vcombine.low %v146_v7, %v150_v8  ;;  %v159_v29 = vld [vmem:[#allocation5 + $0xa8] sm:$0xff]  ;;  %p4997_p3 = por %p4996_p2, %p4995_p1 }
  0x87   :  { %v154_v16 = vld [vmem:[#allocation5 + $0x80] sm:$0xff]  ;;  %v5173_v18 = vpack.c.bf16 %v130_v13, %v123_v12  ;;  %2666 = vmatpush1.bf16.msra.mxu1 %v4470_v10  ;;  %v4105_v33 = vcombine.high %v155_v28, %v159_v29  ;;  %v163_v36 = vld [vmem:[#allocation5 + $0xc8] sm:$0xff]  ;;  %v4104_v39 = vcombine.low %v155_v28, %v159_v29 }
  0x88   :  { %v158_v17 = vld [vmem:[#allocation5 + $0xa0] sm:$0xff]  ;;  %2538 = vmatprep.subr.bf16.mxu0 %v4095_v11  ;;  %2708 = vmatprep.subr.bf16.mxu1 %v4089_v19  ;;  %v167_v37 = vld [vmem:[#allocation5 + $0xe8] sm:$0xff]  ;;  %p4998_p4 = pnand %p4997_p3, %p4991_p0 }
  0x89   :  { %v4103_v24 = vcombine.high %v154_v16, %v158_v17  ;;  %v162_v26 = vld [vmem:[#allocation5 + $0xc0] sm:$0xff]  ;;  %2539 = vmatpush1.bf16.msra.mxu0 %v4094_v20  ;;  %v4102_v30 = vcombine.low %v154_v16, %v158_v17  ;;  %v4113_v41 = vcombine.high %v163_v36, %v167_v37  ;;  %v171_v44 = vld [vmem:[#allocation5 + $0x108] sm:$0xff]  ;;  %v4112_v47 = vcombine.low %v163_v36, %v167_v37 }
  0x8a   :  { %v166_v27 = vld [vmem:[#allocation5 + $0xe0] sm:$0xff]  ;;  %4478 = vmatmul.mubr.msk.bf16.vlgmr.msra.gmra.mrb[0].mxu1 %vm2532_vm0, %v5173_v18  ;;  %v175_v45 = vld [vmem:[#allocation5 + $0x128] sm:$0xff] }
  0x8b   :  { %2709 = vmatpush1.bf16.msra.mxu1 %v4088_v23  ;;  %2540 = vmatprep.subr.bf16.mxu0 %v4103_v24  ;;  %v4111_v32 = vcombine.high %v162_v26, %v166_v27  ;;  %v170_v34 = vld [vmem:[#allocation5 + $0x100] sm:$0xff]  ;;  %v4110_v38 = vcombine.low %v162_v26, %v166_v27  ;;  %v4121_v49 = vcombine.high %v171_v44, %v175_v45  ;;  %v179_v52 = vld [vmem:[#allocation5 + $0x148] sm:$0xff] }
  0x8c   :  { %2710 = vmatprep.subr.bf16.mxu1 %v4097_v25  ;;  %v174_v35 = vld [vmem:[#allocation5 + $0x120] sm:$0xff]  ;;  %v183_v53 = vld [vmem:[#allocation5 + $0x168] sm:$0xff]  ;;  %v4120_v55 = vcombine.low %v171_v44, %v175_v45  ;;  %2740 = vmatprep.mubr.bf16.mxu1 %v5177_v1 }
  0x8d   :  { %2541 = vmatpush1.bf16.msra.mxu0 %v4102_v30  ;;  %v4119_v40 = vcombine.high %v170_v34, %v174_v35  ;;  %v178_v42 = vld [vmem:[#allocation5 + $0x140] sm:$0xff]  ;;  %v4118_v46 = vcombine.low %v170_v34, %v174_v35  ;;  %v4129_v58 = vcombine.high %v179_v52, %v183_v53  ;;  %v187_v62 = vld [vmem:[#allocation5 + $0x188] sm:$0xff]  ;;  %v4128_v3 = vcombine.low %v179_v52, %v183_v53 }
  0x8e   :  { %2542 = vmatprep.subr.bf16.mxu0 %v4111_v32  ;;  %v182_v43 = vld [vmem:[#allocation5 + $0x160] sm:$0xff]  ;;  %v191_v63 = vld [vmem:[#allocation5 + $0x1a8] sm:$0xff] }
  0x8f   :  { %2711 = vmatpush1.bf16.msra.mxu1 %v4096_v31  ;;  %v4127_v48 = vcombine.high %v178_v42, %v182_v43  ;;  %v186_v50 = vld [vmem:[#allocation5 + $0x180] sm:$0xff]  ;;  %v4126_v54 = vcombine.low %v178_v42, %v182_v43  ;;  %v4137_v5 = vcombine.high %v187_v62, %v191_v63  ;;  %v195_v8 = vld [vmem:[#allocation5 + $0x1c8] sm:$0xff]  ;;  %v4136_v11 = vcombine.low %v187_v62, %v191_v63 }
  0x90   :  { %2712 = vmatprep.subr.bf16.mxu1 %v4105_v33  ;;  %v190_v51 = vld [vmem:[#allocation5 + $0x1a0] sm:$0xff]  ;;  %v199_v9 = vld [vmem:[#allocation5 + $0x1e8] sm:$0xff] }
  0x91   :  { %2543 = vmatpush1.bf16.msra.mxu0 %v4110_v38  ;;  %v4135_v56 = vcombine.high %v186_v50, %v190_v51  ;;  %v194_v57 = vld [vmem:[#allocation5 + $0x1c0] sm:$0xff]  ;;  %v4134_v2 = vcombine.low %v186_v50, %v190_v51  ;;  %v4145_v13 = vcombine.high %v195_v8, %v199_v9  ;;  %v203_v16 = vld [vmem:[#allocation5 + $0x208] sm:$0xff]  ;;  %v4144_v20 = vcombine.low %v195_v8, %v199_v9 }
  0x92   :  { %2544 = vmatprep.subr.bf16.mxu0 %v4119_v40  ;;  %v198_v59 = vld [vmem:[#allocation5 + $0x1e0] sm:$0xff]  ;;  %v207_v17 = vld [vmem:[#allocation5 + $0x228] sm:$0xff] }
  0x93   :  { %2713 = vmatpush1.bf16.msra.mxu1 %v4104_v39  ;;  %v4143_v4 = vcombine.high %v194_v57, %v198_v59  ;;  %v202_v6 = vld [vmem:[#allocation5 + $0x200] sm:$0xff]  ;;  %v4142_v10 = vcombine.low %v194_v57, %v198_v59  ;;  %v4153_v22 = vcombine.high %v203_v16, %v207_v17  ;;  %v211_v25 = vld [vmem:[#allocation5 + $0x248] sm:$0xff]  ;;  %v4152_v28 = vcombine.low %v203_v16, %v207_v17 }
  0x94   :  { %2714 = vmatprep.subr.bf16.mxu1 %v4113_v41  ;;  %v206_v7 = vld [vmem:[#allocation5 + $0x220] sm:$0xff]  ;;  %v215_v26 = vld [vmem:[#allocation5 + $0x268] sm:$0xff] }
  0x95   :  { %2545 = vmatpush1.bf16.msra.mxu0 %v4118_v46  ;;  %v4151_v12 = vcombine.high %v202_v6, %v206_v7  ;;  %v210_v14 = vld [vmem:[#allocation5 + $0x240] sm:$0xff]  ;;  %v4150_v19 = vcombine.low %v202_v6, %v206_v7  ;;  %v4161_v30 = vcombine.high %v211_v25, %v215_v26  ;;  %v219_v33 = vld [vmem:[#allocation5 + $0x288] sm:$0xff]  ;;  %v4160_v36 = vcombine.low %v211_v25, %v215_v26 }
  0x96   :  { %2546 = vmatprep.subr.bf16.mxu0 %v4127_v48  ;;  %v214_v15 = vld [vmem:[#allocation5 + $0x260] sm:$0xff]  ;;  %v223_v34 = vld [vmem:[#allocation5 + $0x2a8] sm:$0xff] }
  0x97   :  { %2715 = vmatpush1.bf16.msra.mxu1 %v4112_v47  ;;  %v4159_v21 = vcombine.high %v210_v14, %v214_v15  ;;  %v218_v23 = vld [vmem:[#allocation5 + $0x280] sm:$0xff]  ;;  %v4158_v27 = vcombine.low %v210_v14, %v214_v15  ;;  %v4169_v38 = vcombine.high %v219_v33, %v223_v34  ;;  %v227_v41 = vld [vmem:[#allocation5 + $0x2c8] sm:$0xff]  ;;  %v4168_v44 = vcombine.low %v219_v33, %v223_v34  ;;  %v117_v14 = vld [vmem:[#allocation2] sm:$0xff] }
  0x98   :  { %2716 = vmatprep.subr.bf16.mxu1 %v4121_v49  ;;  %v222_v24 = vld [vmem:[#allocation5 + $0x2a0] sm:$0xff]  ;;  %v231_v42 = vld [vmem:[#allocation5 + $0x2e8] sm:$0xff] }
  0x99   :  { %2547 = vmatpush1.bf16.msra.mxu0 %v4126_v54  ;;  %v4167_v29 = vcombine.high %v218_v23, %v222_v24  ;;  %v226_v31 = vld [vmem:[#allocation5 + $0x2c0] sm:$0xff]  ;;  %v4166_v35 = vcombine.low %v218_v23, %v222_v24  ;;  %v4177_v46 = vcombine.high %v227_v41, %v231_v42  ;;  %v235_v49 = vld [vmem:[#allocation5 + $0x308] sm:$0xff]  ;;  %v4176_v52 = vcombine.low %v227_v41, %v231_v42 }
  0x9a   :  { %2548 = vmatprep.subr.bf16.mxu0 %v4135_v56  ;;  %v230_v32 = vld [vmem:[#allocation5 + $0x2e0] sm:$0xff]  ;;  %v239_v50 = vld [vmem:[#allocation5 + $0x328] sm:$0xff] }
  0x9b   :  { %2717 = vmatpush1.bf16.msra.mxu1 %v4120_v55  ;;  %v4175_v37 = vcombine.high %v226_v31, %v230_v32  ;;  %v234_v39 = vld [vmem:[#allocation5 + $0x300] sm:$0xff]  ;;  %v4174_v43 = vcombine.low %v226_v31, %v230_v32  ;;  %v4185_v54 = vcombine.high %v235_v49, %v239_v50  ;;  %v243_v57 = vld [vmem:[#allocation5 + $0x348] sm:$0xff]  ;;  %v4184_v60 = vcombine.low %v235_v49, %v239_v50 }
  0x9c   :  { %2718 = vmatprep.subr.bf16.mxu1 %v4129_v58  ;;  %v238_v40 = vld [vmem:[#allocation5 + $0x320] sm:$0xff]  ;;  %v247_v58 = vld [vmem:[#allocation5 + $0x368] sm:$0xff] }
  0x9d   :  { %2549 = vmatpush1.bf16.msra.mxu0 %v4134_v2  ;;  %v4183_v45 = vcombine.high %v234_v39, %v238_v40  ;;  %v242_v47 = vld [vmem:[#allocation5 + $0x340] sm:$0xff]  ;;  %v4182_v51 = vcombine.low %v234_v39, %v238_v40  ;;  %v4193_v62 = vcombine.high %v243_v57, %v247_v58  ;;  %v4192_v6 = vcombine.low %v243_v57, %v247_v58  ;;  %v124_v15 = vld [vmem:[#allocation2 + $0x38] sm:$0xff] }
  0x9e   :  { %2550 = vmatprep.subr.bf16.mxu0 %v4143_v4  ;;  %v246_v48 = vld [vmem:[#allocation5 + $0x360] sm:$0xff]  ;;  %v255_v4 = vld [vmem:[#allocation5 + $0x3a8] sm:$0xff]  ;;  %v5181_v24 = vpack.c.bf16 %v124_v15, %v117_v14 }
  0x9f   :  { %2719 = vmatpush1.bf16.msra.mxu1 %v4128_v3  ;;  %v4191_v53 = vcombine.high %v242_v47, %v246_v48  ;;  %v250_v55 = vld [vmem:[#allocation5 + $0x380] sm:$0xff]  ;;  %v4190_v59 = vcombine.low %v242_v47, %v246_v48  ;;  %v251_v3 = vld [vmem:[#allocation5 + $0x388] sm:$0xff] }
  0xa0   :  { %2720 = vmatprep.subr.bf16.mxu1 %v4137_v5  ;;  %v254_v56 = vld [vmem:[#allocation5 + $0x3a0] sm:$0xff]  ;;  %v4201_v8 = vcombine.high %v251_v3, %v255_v4  ;;  %v4200_v16 = vcombine.low %v251_v3, %v255_v4  ;;  %v267_v25 = vld [vmem:[#allocation5 + $0x408] sm:$0xff] }
  0xa1   :  { %2551 = vmatpush1.bf16.msra.mxu0 %v4142_v10  ;;  %v4199_v61 = vcombine.high %v250_v55, %v254_v56  ;;  %v258_v63 = vld [vmem:[#allocation5 + $0x3c0] sm:$0xff]  ;;  %v4198_v5 = vcombine.low %v250_v55, %v254_v56  ;;  %v271_v26 = vld [vmem:[#allocation5 + $0x428] sm:$0xff] }
  0xa2   :  { %2552 = vmatprep.subr.bf16.mxu0 %v4151_v12  ;;  %v262_v2 = vld [vmem:[#allocation5 + $0x3e0] sm:$0xff]  ;;  %v263_v12 = vld [vmem:[#allocation5 + $0x3e8] sm:$0xff]  ;;  %v4217_v31 = vcombine.high %v267_v25, %v271_v26 }
  0xa3   :  { %2721 = vmatpush1.bf16.msra.mxu1 %v4136_v11  ;;  %v4207_v7 = vcombine.high %v258_v63, %v262_v2  ;;  %v266_v9 = vld [vmem:[#allocation5 + $0x400] sm:$0xff]  ;;  %v259_v11 = vld [vmem:[#allocation5 + $0x3c8] sm:$0xff] }
  0xa4   :  { %2722 = vmatprep.subr.bf16.mxu1 %v4145_v13  ;;  %v270_v10 = vld [vmem:[#allocation5 + $0x420] sm:$0xff]  ;;  %v4206_v13 = vcombine.low %v258_v63, %v262_v2  ;;  %v275_v34 = vld [vmem:[#allocation5 + $0x448] sm:$0xff] }
  0xa5   :  { %2553 = vmatpush1.bf16.msra.mxu0 %v4150_v19  ;;  %v4215_v17 = vcombine.high %v266_v9, %v270_v10  ;;  %v120_v19 = vld [vmem:[#allocation2 + $0x18] sm:$0xff]  ;;  %v278_v23 = vld [vmem:[#allocation5 + $0x460] sm:$0xff] }
  0xa6   :  { %2554 = vmatprep.subr.bf16.mxu0 %v4159_v21  ;;  %v4209_v21 = vcombine.high %v259_v11, %v263_v12  ;;  %v282_v32 = vld [vmem:[#allocation5 + $0x480] sm:$0xff]  ;;  %v283_v42 = vld [vmem:[#allocation5 + $0x488] sm:$0xff] }
  0xa7   :  { %2723 = vmatpush1.bf16.msra.mxu1 %v4144_v20  ;;  %v127_v20 = vld [vmem:[#allocation2 + $0x50] sm:$0xff]  ;;  %v291_v49 = vld [vmem:[#allocation5 + $0x4c8] sm:$0xff] }
  0xa8   :  { %2724 = vmatprep.subr.bf16.mxu1 %v4153_v22  ;;  %v274_v22 = vld [vmem:[#allocation5 + $0x440] sm:$0xff]  ;;  %v295_v50 = vld [vmem:[#allocation5 + $0x4e8] sm:$0xff] }
  0xa9   :  { %2555 = vmatpush1.bf16.msra.mxu0 %v4158_v27  ;;  %v4214_v27 = vcombine.low %v266_v9, %v270_v10  ;;  %v286_v33 = vld [vmem:[#allocation5 + $0x4a0] sm:$0xff]  ;;  %v299_v57 = vld [vmem:[#allocation5 + $0x508] sm:$0xff]  ;;  %v4240_v63 = vcombine.low %v291_v49, %v295_v50 }
  0xaa   :  { %2556 = vmatprep.subr.bf16.mxu0 %v4167_v29  ;;  %v4208_v29 = vcombine.low %v259_v11, %v263_v12  ;;  %v290_v39 = vld [vmem:[#allocation5 + $0x4c0] sm:$0xff]  ;;  %v303_v58 = vld [vmem:[#allocation5 + $0x528] sm:$0xff] }
  0xab   :  { %2725 = vmatpush1.bf16.msra.mxu1 %v4152_v28  ;;  %v5183_v28 = vpack.c.bf16 %v127_v20, %v120_v19  ;;  %v294_v40 = vld [vmem:[#allocation5 + $0x4e0] sm:$0xff]  ;;  %v307_v3 = vld [vmem:[#allocation5 + $0x548] sm:$0xff]  ;;  %v4248_v9 = vcombine.low %v299_v57, %v303_v58 }
  0xac   :  { %2726 = vmatprep.subr.bf16.mxu1 %v4161_v30  ;;  %v4223_v30 = vcombine.high %v274_v22, %v278_v23  ;;  %v4239_v48 = vcombine.high %v290_v39, %v294_v40  ;;  %v311_v4 = vld [vmem:[#allocation5 + $0x568] sm:$0xff]  ;;  %v330_v15 = vld [vmem:[#allocation5 + $0x600] sm:$0xff] }
  0xad   :  { %2557 = vmatpush1.bf16.msra.mxu0 %v4166_v35  ;;  %v279_v35 = vld [vmem:[#allocation5 + $0x468] sm:$0xff] }
  0xae   :  { %2558 = vmatprep.subr.bf16.mxu0 %v4175_v37  ;;  %v4216_v37 = vcombine.low %v267_v25, %v271_v26  ;;  %v4225_v41 = vcombine.high %v275_v34, %v279_v35  ;;  %v4224_v47 = vcombine.low %v275_v34, %v279_v35  ;;  %v315_v11 = vld [vmem:[#allocation5 + $0x588] sm:$0xff] }
  0xaf   :  { %2727 = vmatpush1.bf16.msra.mxu1 %v4160_v36  ;;  %v4222_v36 = vcombine.low %v274_v22, %v278_v23  ;;  %v319_v12 = vld [vmem:[#allocation5 + $0x5a8] sm:$0xff] }
  0xb0   :  { %2728 = vmatprep.subr.bf16.mxu1 %v4169_v38  ;;  %v4231_v38 = vcombine.high %v282_v32, %v286_v33  ;;  %v323_v20 = vld [vmem:[#allocation5 + $0x5c8] sm:$0xff]  ;;  %v4265_v22 = vcombine.high %v315_v11, %v319_v12  ;;  %v4264_v25 = vcombine.low %v315_v11, %v319_v12 }
  0xb1   :  { %2559 = vmatpush1.bf16.msra.mxu0 %v4174_v43  ;;  %v287_v43 = vld [vmem:[#allocation5 + $0x4a8] sm:$0xff] }
  0xb2   :  { %2560 = vmatprep.subr.bf16.mxu0 %v4183_v45  ;;  %v298_v45 = vld [vmem:[#allocation5 + $0x500] sm:$0xff]  ;;  %v4232_v55 = vcombine.low %v283_v42, %v287_v43 }
  0xb3   :  { %2729 = vmatpush1.bf16.msra.mxu1 %v4168_v44  ;;  %v4230_v44 = vcombine.low %v282_v32, %v286_v33  ;;  %v335_v32 = vld [vmem:[#allocation5 + $0x628] sm:$0xff] }
  0xb4   :  { %2730 = vmatprep.subr.bf16.mxu1 %v4177_v46  ;;  %v302_v46 = vld [vmem:[#allocation5 + $0x520] sm:$0xff] }
  0xb5   :  { %2561 = vmatpush1.bf16.msra.mxu0 %v4182_v51  ;;  %v4233_v51 = vcombine.high %v283_v42, %v287_v43  ;;  %v4247_v56 = vcombine.high %v298_v45, %v302_v46 }
  0xb6   :  { %2562 = vmatprep.subr.bf16.mxu0 %v4191_v53  ;;  %v306_v53 = vld [vmem:[#allocation5 + $0x540] sm:$0xff] }
  0xb7   :  { %2731 = vmatpush1.bf16.msra.mxu1 %v4176_v52  ;;  %v4238_v52 = vcombine.low %v290_v39, %v294_v40  ;;  %v339_v39 = vld [vmem:[#allocation5 + $0x648] sm:$0xff] }
  0xb8   :  { %2732 = vmatprep.subr.bf16.mxu1 %v4185_v54  ;;  %v310_v54 = vld [vmem:[#allocation5 + $0x560] sm:$0xff]  ;;  %v343_v40 = vld [vmem:[#allocation5 + $0x668] sm:$0xff] }
  0xb9   :  { %2563 = vmatpush1.bf16.msra.mxu0 %v4190_v59  ;;  %v4241_v59 = vcombine.high %v291_v49, %v295_v50  ;;  %v4255_v2 = vcombine.high %v306_v53, %v310_v54  ;;  %v4288_v50 = vcombine.low %v339_v39, %v343_v40 }
  0xba   :  { %2564 = vmatprep.subr.bf16.mxu0 %v4199_v61  ;;  %v314_v61 = vld [vmem:[#allocation5 + $0x580] sm:$0xff] }
  0xbb   :  { %2733 = vmatpush1.bf16.msra.mxu1 %v4184_v60  ;;  %v4246_v60 = vcombine.low %v298_v45, %v302_v46  ;;  %v358_v45 = vld [vmem:[#allocation5 + $0x6e0] sm:$0xff]  ;;  %v4289_v46 = vcombine.high %v339_v39, %v343_v40  ;;  %v395_v40 = vld [vmem:[#allocation5 + $0x808] sm:$0xff] }
  0xbc   :  { %2734 = vmatprep.subr.bf16.mxu1 %v4193_v62  ;;  %v318_v62 = vld [vmem:[#allocation5 + $0x5a0] sm:$0xff] }
  0xbd   :  { %2565 = vmatpush1.bf16.msra.mxu0 %v4198_v5  ;;  %v4249_v5 = vcombine.high %v299_v57, %v303_v58  ;;  %v4263_v10 = vcombine.high %v314_v61, %v318_v62  ;;  %v4262_v14 = vcombine.low %v314_v61, %v318_v62  ;;  %v374_v61 = vld [vmem:[#allocation5 + $0x760] sm:$0xff] }
  0xbe   :  { %2566 = vmatprep.subr.bf16.mxu0 %v4207_v7  ;;  %v322_v7 = vld [vmem:[#allocation5 + $0x5c0] sm:$0xff] }
  0xbf   :  { %2735 = vmatpush1.bf16.msra.mxu1 %v4192_v6  ;;  %v4254_v6 = vcombine.low %v306_v53, %v310_v54  ;;  %v366_v53 = vld [vmem:[#allocation5 + $0x720] sm:$0xff] }
  0xc0   :  { %2736 = vmatprep.subr.bf16.mxu1 %v4201_v8  ;;  %v326_v8 = vld [vmem:[#allocation5 + $0x5e0] sm:$0xff] }
  0xc1   :  { %2567 = vmatpush1.bf16.msra.mxu0 %v4206_v13  ;;  %v4257_v13 = vcombine.high %v307_v3, %v311_v4  ;;  %v4271_v19 = vcombine.high %v322_v7, %v326_v8  ;;  %v4270_v23 = vcombine.low %v322_v7, %v326_v8  ;;  %v382_v7 = vld [vmem:[#allocation5 + $0x7a0] sm:$0xff] }
  0xc2   :  { %2579 = vmatprep.subr.bf16.mxu0 %v4215_v17  ;;  %v4256_v17 = vcombine.low %v307_v3, %v311_v4 }
  0xc3   :  { %2737 = vmatpush1.bf16.msra.mxu1 %v4200_v16  ;;  %v334_v16 = vld [vmem:[#allocation5 + $0x620] sm:$0xff] }
  0xc4   :  { %2738 = vmatprep.subr.bf16.mxu1 %v4209_v21  ;;  %2569 = vmatmul.mubr.bf16.vlgmr.msra.gmra.mrb[0].mxu0 %v5181_v24  ;;  %v327_v21 = vld [vmem:[#allocation5 + $0x5e8] sm:$0xff]  ;;  %v4279_v26 = vcombine.high %v330_v15, %v334_v16  ;;  %v4278_v33 = vcombine.low %v330_v15, %v334_v16  ;;  %v390_v15 = vld [vmem:[#allocation5 + $0x7e0] sm:$0xff] }
  0xc5   :  { %2580 = vmatpush1.bf16.msra.mxu0 %v4214_v27  ;;  %2611 = vmatprep.mubr.bf16.mxu0 %v5183_v28  ;;  %v338_v27 = vld [vmem:[#allocation5 + $0x640] sm:$0xff]  ;;  %v4272_v34 = vcombine.low %v323_v20, %v327_v21 }
  0xc6   :  { %2581 = vmatprep.subr.bf16.mxu0 %v4223_v30  ;;  %v4273_v30 = vcombine.high %v323_v20, %v327_v21  ;;  %v394_v21 = vld [vmem:[#allocation5 + $0x800] sm:$0xff] }
  0xc7   :  { %2739 = vmatpush1.bf16.msra.mxu1 %v4208_v29  ;;  %v342_v29 = vld [vmem:[#allocation5 + $0x660] sm:$0xff] }
  0xc8   :  { %2751 = vmatprep.subr.bf16.mxu1 %v4217_v31  ;;  %v331_v31 = vld [vmem:[#allocation5 + $0x608] sm:$0xff]  ;;  %v4287_v35 = vcombine.high %v338_v27, %v342_v29 }
  0xc9   :  { %2582 = vmatpush1.bf16.msra.mxu0 %v4222_v36  ;;  %v346_v36 = vld [vmem:[#allocation5 + $0x680] sm:$0xff]  ;;  %v4280_v42 = vcombine.low %v331_v31, %v335_v32 }
  0xca   :  { %2741 = vmatmul.mubr.bf16.vlgmr.msra.gmra.mrb[4].mxu1 %v5181_v24  ;;  %2583 = vmatprep.subr.bf16.mxu0 %v4231_v38  ;;  %v4281_v38 = vcombine.high %v331_v31, %v335_v32  ;;  %v126_v31 = vld [vmem:[#allocation2 + $0x48] sm:$0xff] }
  0xcb   :  { %2752 = vmatpush1.bf16.msra.mxu1 %v4216_v37  ;;  %2783 = vmatprep.mubr.bf16.mxu1 %v5183_v28  ;;  %v350_v37 = vld [vmem:[#allocation5 + $0x6a0] sm:$0xff] }
  0xcc   :  { %2753 = vmatprep.subr.bf16.mxu1 %v4225_v41  ;;  %v4286_v41 = vcombine.low %v338_v27, %v342_v29  ;;  %v4295_v43 = vcombine.high %v346_v36, %v350_v37  ;;  %v4294_v49 = vcombine.low %v346_v36, %v350_v37  ;;  %v391_v27 = vld [vmem:[#allocation5 + $0x7e8] sm:$0xff]  ;;  %v122_v37 = vld [vmem:[#allocation2 + $0x28] sm:$0xff] }
  0xcd   :  { %2584 = vmatpush1.bf16.msra.mxu0 %v4230_v44  ;;  %v354_v44 = vld [vmem:[#allocation5 + $0x6c0] sm:$0xff] }
  0xce   :  { %2585 = vmatprep.subr.bf16.mxu0 %v4239_v48  ;;  %v351_v48 = vld [vmem:[#allocation5 + $0x6a8] sm:$0xff]  ;;  %v4302_v57 = vcombine.low %v354_v44, %v358_v45 }
  0xcf   :  { %2754 = vmatpush1.bf16.msra.mxu1 %v4224_v47  ;;  %v347_v47 = vld [vmem:[#allocation5 + $0x688] sm:$0xff] }
  0xd0   :  { %2755 = vmatprep.subr.bf16.mxu1 %v4233_v51  ;;  %v4303_v51 = vcombine.high %v354_v44, %v358_v45  ;;  %v4297_v54 = vcombine.high %v347_v47, %v351_v48  ;;  %v4296_v58 = vcombine.low %v347_v47, %v351_v48  ;;  %v410_v47 = vld [vmem:[#allocation5 + $0x880] sm:$0xff] }
  0xd1   :  { %2586 = vmatpush1.bf16.msra.mxu0 %v4238_v52  ;;  %v362_v52 = vld [vmem:[#allocation5 + $0x700] sm:$0xff] }
  0xd2   :  { %2587 = vmatprep.subr.bf16.mxu0 %v4247_v56  ;;  %v359_v56 = vld [vmem:[#allocation5 + $0x6e8] sm:$0xff]  ;;  %v4310_v3 = vcombine.low %v362_v52, %v366_v53  ;;  %v414_v48 = vld [vmem:[#allocation5 + $0x8a0] sm:$0xff] }
  0xd3   :  { %2756 = vmatpush1.bf16.msra.mxu1 %v4232_v55  ;;  %v355_v55 = vld [vmem:[#allocation5 + $0x6c8] sm:$0xff] }
  0xd4   :  { %2757 = vmatprep.subr.bf16.mxu1 %v4241_v59  ;;  %v4311_v59 = vcombine.high %v362_v52, %v366_v53  ;;  %v4305_v62 = vcombine.high %v355_v55, %v359_v56  ;;  %v4304_v4 = vcombine.low %v355_v55, %v359_v56  ;;  %v418_v55 = vld [vmem:[#allocation5 + $0x8c0] sm:$0xff] }
  0xd5   :  { %2588 = vmatpush1.bf16.msra.mxu0 %v4246_v60  ;;  %v370_v60 = vld [vmem:[#allocation5 + $0x740] sm:$0xff] }
  0xd6   :  { %2589 = vmatprep.subr.bf16.mxu0 %v4255_v2  ;;  %v367_v2 = vld [vmem:[#allocation5 + $0x728] sm:$0xff]  ;;  %v4318_v11 = vcombine.low %v370_v60, %v374_v61  ;;  %v422_v56 = vld [vmem:[#allocation5 + $0x8e0] sm:$0xff] }
  0xd7   :  { %2758 = vmatpush1.bf16.msra.mxu1 %v4240_v63  ;;  %v363_v63 = vld [vmem:[#allocation5 + $0x708] sm:$0xff] }
  0xd8   :  { %2759 = vmatprep.subr.bf16.mxu1 %v4249_v5  ;;  %v4319_v5 = vcombine.high %v370_v60, %v374_v61  ;;  %v4313_v8 = vcombine.high %v363_v63, %v367_v2  ;;  %v4312_v12 = vcombine.low %v363_v63, %v367_v2  ;;  %v4358_v60 = vcombine.low %v410_v47, %v414_v48  ;;  %v426_v63 = vld [vmem:[#allocation5 + $0x900] sm:$0xff] }
  0xd9   :  { %2590 = vmatpush1.bf16.msra.mxu0 %v4254_v6  ;;  %v378_v6 = vld [vmem:[#allocation5 + $0x780] sm:$0xff] }
  0xda   :  { %2591 = vmatprep.subr.bf16.mxu0 %v4263_v10  ;;  %v375_v10 = vld [vmem:[#allocation5 + $0x768] sm:$0xff]  ;;  %v4326_v20 = vcombine.low %v378_v6, %v382_v7  ;;  %v430_v2 = vld [vmem:[#allocation5 + $0x920] sm:$0xff] }
  0xdb   :  { %2760 = vmatpush1.bf16.msra.mxu1 %v4248_v9  ;;  %v371_v9 = vld [vmem:[#allocation5 + $0x748] sm:$0xff] }
  0xdc   :  { %2761 = vmatprep.subr.bf16.mxu1 %v4257_v13  ;;  %v4327_v13 = vcombine.high %v378_v6, %v382_v7  ;;  %v4321_v16 = vcombine.high %v371_v9, %v375_v10  ;;  %v4366_v6 = vcombine.low %v418_v55, %v422_v56 }
  0xdd   :  { %2592 = vmatpush1.bf16.msra.mxu0 %v4262_v14  ;;  %v386_v14 = vld [vmem:[#allocation5 + $0x7c0] sm:$0xff] }
  0xde   :  { %2593 = vmatprep.subr.bf16.mxu0 %v4271_v19  ;;  %v383_v19 = vld [vmem:[#allocation5 + $0x7a8] sm:$0xff]  ;;  %v4334_v32 = vcombine.low %v386_v14, %v390_v15 }
  0xdf   :  { %2762 = vmatpush1.bf16.msra.mxu1 %v4256_v17  ;;  %v379_v17 = vld [vmem:[#allocation5 + $0x788] sm:$0xff] }
  0xe0   :  { %2763 = vmatprep.subr.bf16.mxu1 %v4265_v22  ;;  %v398_v22 = vld [vmem:[#allocation5 + $0x820] sm:$0xff]  ;;  %v4329_v29 = vcombine.high %v379_v17, %v383_v19 }
  0xe1   :  { %2594 = vmatpush1.bf16.msra.mxu0 %v4270_v23  ;;  %v4320_v23 = vcombine.low %v371_v9, %v375_v10  ;;  %v4343_v36 = vcombine.high %v394_v21, %v398_v22  ;;  %v434_v10 = vld [vmem:[#allocation5 + $0x940] sm:$0xff] }
  0xe2   :  { %2595 = vmatprep.subr.bf16.mxu0 %v4279_v26  ;;  %v387_v26 = vld [vmem:[#allocation5 + $0x7c8] sm:$0xff] }
  0xe3   :  { %2764 = vmatpush1.bf16.msra.mxu1 %v4264_v25  ;;  %v4335_v25 = vcombine.high %v386_v14, %v390_v15  ;;  %v4337_v39 = vcombine.high %v387_v26, %v391_v27  ;;  %v4336_v45 = vcombine.low %v387_v26, %v391_v27  ;;  %v4374_v14 = vcombine.low %v426_v63, %v430_v2 }
  0xe4   :  { %2765 = vmatprep.subr.bf16.mxu1 %v4273_v30  ;;  %v119_v30 = vld [vmem:[#allocation2 + $0x10] sm:$0xff] }
  0xe5   :  { %2596 = vmatpush1.bf16.msra.mxu0 %v4278_v33  ;;  %v402_v33 = vld [vmem:[#allocation5 + $0x840] sm:$0xff] }
  0xe6   :  { %2597 = vmatprep.subr.bf16.mxu0 %v4287_v35  ;;  %v4328_v35 = vcombine.low %v379_v17, %v383_v19  ;;  %v442_v19 = vld [vmem:[#allocation5 + $0x980] sm:$0xff] }
  0xe7   :  { %2766 = vmatpush1.bf16.msra.mxu1 %v4272_v34  ;;  %v406_v34 = vld [vmem:[#allocation5 + $0x860] sm:$0xff] }
  0xe8   :  { %2767 = vmatprep.subr.bf16.mxu1 %v4281_v38  ;;  %v129_v38 = vld [vmem:[#allocation2 + $0x60] sm:$0xff]  ;;  %v4350_v52 = vcombine.low %v402_v33, %v406_v34 }
  0xe9   :  { %2598 = vmatpush1.bf16.msra.mxu0 %v4286_v41  ;;  %v399_v41 = vld [vmem:[#allocation5 + $0x828] sm:$0xff]  ;;  %v5191_v44 = vpack.c.bf16 %v129_v38, %v122_v37  ;;  %v458_v37 = vld [vmem:[#allocation5 + $0xa00] sm:$0xff] }
  0xea   :  { %2599 = vmatprep.subr.bf16.mxu0 %v4295_v43  ;;  %v4342_v43 = vcombine.low %v394_v21, %v398_v22  ;;  %v4344_v53 = vcombine.low %v395_v40, %v399_v41  ;;  %v435_v21 = vld [vmem:[#allocation5 + $0x948] sm:$0xff]  ;;  %v462_v38 = vld [vmem:[#allocation5 + $0xa20] sm:$0xff] }
  0xeb   :  { %2768 = vmatpush1.bf16.msra.mxu1 %v4280_v42  ;;  %v5189_v42 = vpack.c.bf16 %v126_v31, %v119_v30  ;;  %v439_v22 = vld [vmem:[#allocation5 + $0x968] sm:$0xff]  ;;  %v454_v30 = vld [vmem:[#allocation5 + $0x9e0] sm:$0xff] }
  0xec   :  { %2769 = vmatprep.subr.bf16.mxu1 %v4289_v46  ;;  %v4351_v46 = vcombine.high %v402_v33, %v406_v34  ;;  %v4385_v27 = vcombine.high %v435_v21, %v439_v22  ;;  %v443_v31 = vld [vmem:[#allocation5 + $0x988] sm:$0xff]  ;;  %v4384_v34 = vcombine.low %v435_v21, %v439_v22 }
  0xed   :  { %2600 = vmatpush1.bf16.msra.mxu0 %v4294_v49  ;;  %v4345_v49 = vcombine.high %v395_v40, %v399_v41  ;;  %v455_v40 = vld [vmem:[#allocation5 + $0x9e8] sm:$0xff] }
  0xee   :  { %2601 = vmatprep.subr.bf16.mxu0 %v4303_v51  ;;  %v407_v51 = vld [vmem:[#allocation5 + $0x868] sm:$0xff] }
  0xef   :  { %2770 = vmatpush1.bf16.msra.mxu1 %v4288_v50  ;;  %v403_v50 = vld [vmem:[#allocation5 + $0x848] sm:$0xff] }
  0xf0   :  { %2771 = vmatprep.subr.bf16.mxu1 %v4297_v54  ;;  %v4359_v54 = vcombine.high %v410_v47, %v414_v48  ;;  %v4352_v61 = vcombine.low %v403_v50, %v407_v51  ;;  %v466_v47 = vld [vmem:[#allocation5 + $0xa40] sm:$0xff]  ;;  %v495_v21 = vld [vmem:[#allocation5 + $0xb28] sm:$0xff] }
  0xf1   :  { %2602 = vmatpush1.bf16.msra.mxu0 %v4302_v57  ;;  %v4353_v57 = vcombine.high %v403_v50, %v407_v51  ;;  %v470_v48 = vld [vmem:[#allocation5 + $0xa60] sm:$0xff]  ;;  %v463_v50 = vld [vmem:[#allocation5 + $0xa28] sm:$0xff]  ;;  %v4406_v51 = vcombine.low %v458_v37, %v462_v38 }
  0xf2   :  { %2603 = vmatprep.subr.bf16.mxu0 %v4311_v59  ;;  %v415_v59 = vld [vmem:[#allocation5 + $0x8a8] sm:$0xff] }
  0xf3   :  { %2772 = vmatpush1.bf16.msra.mxu1 %v4296_v58  ;;  %v411_v58 = vld [vmem:[#allocation5 + $0x888] sm:$0xff] }
  0xf4   :  { %2773 = vmatprep.subr.bf16.mxu1 %v4305_v62  ;;  %v4367_v62 = vcombine.high %v418_v55, %v422_v56  ;;  %v4360_v7 = vcombine.low %v411_v58, %v415_v59  ;;  %v474_v55 = vld [vmem:[#allocation5 + $0xa80] sm:$0xff] }
  0xf5   :  { %2604 = vmatpush1.bf16.msra.mxu0 %v4310_v3  ;;  %v4361_v3 = vcombine.high %v411_v58, %v415_v59  ;;  %v478_v56 = vld [vmem:[#allocation5 + $0xaa0] sm:$0xff]  ;;  %v471_v58 = vld [vmem:[#allocation5 + $0xa68] sm:$0xff]  ;;  %v4414_v59 = vcombine.low %v466_v47, %v470_v48 }
  0xf6   :  { %2605 = vmatprep.subr.bf16.mxu0 %v4319_v5  ;;  %v423_v5 = vld [vmem:[#allocation5 + $0x8e8] sm:$0xff] }
  0xf7   :  { %2774 = vmatpush1.bf16.msra.mxu1 %v4304_v4  ;;  %v419_v4 = vld [vmem:[#allocation5 + $0x8c8] sm:$0xff] }
  0xf8   :  { %2775 = vmatprep.subr.bf16.mxu1 %v4313_v8  ;;  %v4375_v8 = vcombine.high %v426_v63, %v430_v2  ;;  %v4369_v9 = vcombine.high %v419_v4, %v423_v5  ;;  %v4368_v15 = vcombine.low %v419_v4, %v423_v5  ;;  %v482_v63 = vld [vmem:[#allocation5 + $0xac0] sm:$0xff]  ;;  %v479_v4 = vld [vmem:[#allocation5 + $0xaa8] sm:$0xff]  ;;  %v4422_v5 = vcombine.low %v474_v55, %v478_v56 }
  0xf9   :  { %2606 = vmatpush1.bf16.msra.mxu0 %v4318_v11  ;;  %v438_v11 = vld [vmem:[#allocation5 + $0x960] sm:$0xff] }
  0xfa   :  { %2607 = vmatprep.subr.bf16.mxu0 %v4327_v13  ;;  %v431_v13 = vld [vmem:[#allocation5 + $0x928] sm:$0xff]  ;;  %v486_v2 = vld [vmem:[#allocation5 + $0xae0] sm:$0xff] }
  0xfb   :  { %2776 = vmatpush1.bf16.msra.mxu1 %v4312_v12  ;;  %v427_v12 = vld [vmem:[#allocation5 + $0x908] sm:$0xff] }
  0xfc   :  { %2777 = vmatprep.subr.bf16.mxu1 %v4321_v16  ;;  %v4383_v16 = vcombine.high %v434_v10, %v438_v11  ;;  %v4377_v17 = vcombine.high %v427_v12, %v431_v13 }
  0xfd   :  { %2608 = vmatpush1.bf16.msra.mxu0 %v4326_v20  ;;  %v446_v20 = vld [vmem:[#allocation5 + $0x9a0] sm:$0xff] }
  0xfe   :  { %2609 = vmatprep.subr.bf16.mxu0 %v4335_v25  ;;  %v4376_v25 = vcombine.low %v427_v12, %v431_v13  ;;  %v4391_v26 = vcombine.high %v442_v19, %v446_v20  ;;  %v4390_v33 = vcombine.low %v442_v19, %v446_v20  ;;  %v487_v12 = vld [vmem:[#allocation5 + $0xae8] sm:$0xff]  ;;  %v4430_v13 = vcombine.low %v482_v63, %v486_v2  ;;  %v502_v19 = vld [vmem:[#allocation5 + $0xb60] sm:$0xff] }
  0xff   :  { %2778 = vmatpush1.bf16.msra.mxu1 %v4320_v23  ;;  %v4382_v23 = vcombine.low %v434_v10, %v438_v11  ;;  %v494_v10 = vld [vmem:[#allocation5 + $0xb20] sm:$0xff]  ;;  %v483_v11 = vld [vmem:[#allocation5 + $0xac8] sm:$0xff] }
 0x100   :  { %2779 = vmatprep.subr.bf16.mxu1 %v4329_v29  ;;  %v450_v29 = vld [vmem:[#allocation5 + $0x9c0] sm:$0xff]  ;;  %v491_v20 = vld [vmem:[#allocation5 + $0xb08] sm:$0xff] }
 0x101   :  { %2610 = vmatpush1.bf16.msra.mxu0 %v4334_v32  ;;  %v447_v32 = vld [vmem:[#allocation5 + $0x9a8] sm:$0xff]  ;;  %v4398_v41 = vcombine.low %v450_v29, %v454_v30 }
 0x102   :  { %2622 = vmatprep.subr.bf16.mxu0 %v4343_v36  ;;  %v4393_v36 = vcombine.high %v443_v31, %v447_v32 }
 0x103   :  { %2780 = vmatpush1.bf16.msra.mxu1 %v4328_v35  ;;  %v4399_v35 = vcombine.high %v450_v29, %v454_v30  ;;  %v510_v29 = vld [vmem:[#allocation5 + $0xba0] sm:$0xff]  ;;  %v499_v30 = vld [vmem:[#allocation5 + $0xb48] sm:$0xff] }
 0x104   :  { %2781 = vmatprep.subr.bf16.mxu1 %v4337_v39  ;;  %2612 = vmatmul.mubr.bf16.vlgmr.msra.gmra.mrb[0].mxu0 %v5189_v42  ;;  %v451_v39 = vld [vmem:[#allocation5 + $0x9c8] sm:$0xff] }
 0x105   :  { %2623 = vmatpush1.bf16.msra.mxu0 %v4342_v43  ;;  %2654 = vmatprep.mubr.bf16.mxu0 %v5191_v44  ;;  %v4392_v43 = vcombine.low %v443_v31, %v447_v32  ;;  %v503_v31 = vld [vmem:[#allocation5 + $0xb68] sm:$0xff] }
 0x106   :  { %2624 = vmatprep.subr.bf16.mxu0 %v4351_v46  ;;  %v4401_v46 = vcombine.high %v451_v39, %v455_v40 }
 0x107   :  { %2782 = vmatpush1.bf16.msra.mxu1 %v4336_v45  ;;  %v4407_v45 = vcombine.high %v458_v37, %v462_v38  ;;  %v518_v37 = vld [vmem:[#allocation5 + $0xbe0] sm:$0xff]  ;;  %v507_v38 = vld [vmem:[#allocation5 + $0xb88] sm:$0xff] }
 0x108   :  { %2794 = vmatprep.subr.bf16.mxu1 %v4345_v49  ;;  %v459_v49 = vld [vmem:[#allocation5 + $0xa08] sm:$0xff] }
 0x109   :  { %2625 = vmatpush1.bf16.msra.mxu0 %v4350_v52  ;;  %v4400_v52 = vcombine.low %v451_v39, %v455_v40  ;;  %v511_v39 = vld [vmem:[#allocation5 + $0xba8] sm:$0xff] }
 0x10a   :  { %2784 = vmatmul.mubr.bf16.vlgmr.msra.gmra.mrb[4].mxu1 %v5189_v42  ;;  %2626 = vmatprep.subr.bf16.mxu0 %v4359_v54  ;;  %v4409_v54 = vcombine.high %v459_v49, %v463_v50 }
 0x10b   :  { %2795 = vmatpush1.bf16.msra.mxu1 %v4344_v53  ;;  %2826 = vmatprep.mubr.bf16.mxu1 %v5191_v44  ;;  %v4415_v53 = vcombine.high %v466_v47, %v470_v48  ;;  %v144_v47 = vld [vmem:[#allocation5 + $0x30] sm:$0xff]  ;;  %v515_v48 = vld [vmem:[#allocation5 + $0xbc8] sm:$0xff] }
 0x10c   :  { %2796 = vmatprep.subr.bf16.mxu1 %v4353_v57  ;;  %v467_v57 = vld [vmem:[#allocation5 + $0xa48] sm:$0xff] }
 0x10d   :  { %2627 = vmatpush1.bf16.msra.mxu0 %v4358_v60  ;;  %v4408_v60 = vcombine.low %v459_v49, %v463_v50  ;;  %v519_v49 = vld [vmem:[#allocation5 + $0xbe8] sm:$0xff] }
 0x10e   :  { %2628 = vmatprep.subr.bf16.mxu0 %v4367_v62  ;;  %v4417_v62 = vcombine.high %v467_v57, %v471_v58 }
 0x10f   :  { %2797 = vmatpush1.bf16.msra.mxu1 %v4352_v61  ;;  %v4423_v61 = vcombine.high %v474_v55, %v478_v56  ;;  %v4465_v55 = vcombine.high %v515_v48, %v519_v49  ;;  %v148_v56 = vld [vmem:[#allocation5 + $0x50] sm:$0xff] }
 0x110   :  { %2798 = vmatprep.subr.bf16.mxu1 %v4361_v3  ;;  %v475_v3 = vld [vmem:[#allocation5 + $0xa88] sm:$0xff] }
 0x111   :  { %2629 = vmatpush1.bf16.msra.mxu0 %v4366_v6  ;;  %v4416_v6 = vcombine.low %v467_v57, %v471_v58  ;;  %v152_v57 = vld [vmem:[#allocation5 + $0x70] sm:$0xff] }
 0x112   :  { %2630 = vmatprep.subr.bf16.mxu0 %v4375_v8  ;;  %v4425_v8 = vcombine.high %v475_v3, %v479_v4 }
 0x113   :  { %2799 = vmatpush1.bf16.msra.mxu1 %v4360_v7  ;;  %v4431_v7 = vcombine.high %v482_v63, %v486_v2  ;;  %v4099_v63 = vcombine.high %v148_v56, %v152_v57 }
 0x114   :  { %2800 = vmatprep.subr.bf16.mxu1 %v4369_v9  ;;  %v490_v9 = vld [vmem:[#allocation5 + $0xb00] sm:$0xff] }
 0x115   :  { %2631 = vmatpush1.bf16.msra.mxu0 %v4374_v14  ;;  %v4424_v14 = vcombine.low %v475_v3, %v479_v4  ;;  %v4438_v22 = vcombine.low %v490_v9, %v494_v10  ;;  %v156_v3 = vld [vmem:[#allocation5 + $0x90] sm:$0xff] }
 0x116   :  { %2632 = vmatprep.subr.bf16.mxu0 %v4383_v16  ;;  %v4433_v16 = vcombine.high %v483_v11, %v487_v12  ;;  %v160_v4 = vld [vmem:[#allocation5 + $0xb0] sm:$0xff] }
 0x117   :  { %2801 = vmatpush1.bf16.msra.mxu1 %v4368_v15  ;;  %v4439_v15 = vcombine.high %v490_v9, %v494_v10  ;;  %v4107_v9 = vcombine.high %v156_v3, %v160_v4  ;;  %v164_v10 = vld [vmem:[#allocation5 + $0xd0] sm:$0xff] }
 0x118   :  { %2802 = vmatprep.subr.bf16.mxu1 %v4377_v17  ;;  %v498_v17 = vld [vmem:[#allocation5 + $0xb40] sm:$0xff] }
 0x119   :  { %2633 = vmatpush1.bf16.msra.mxu0 %v4382_v23  ;;  %v4432_v23 = vcombine.low %v483_v11, %v487_v12  ;;  %v4446_v32 = vcombine.low %v498_v17, %v502_v19  ;;  %v168_v11 = vld [vmem:[#allocation5 + $0xf0] sm:$0xff] }
 0x11a   :  { %2634 = vmatprep.subr.bf16.mxu0 %v4391_v26  ;;  %v4441_v26 = vcombine.high %v491_v20, %v495_v21 }
 0x11b   :  { %2803 = vmatpush1.bf16.msra.mxu1 %v4376_v25  ;;  %v4447_v25 = vcombine.high %v498_v17, %v502_v19  ;;  %v4114_v17 = vcombine.low %v164_v10, %v168_v11 }
 0x11c   :  { %2804 = vmatprep.subr.bf16.mxu1 %v4385_v27  ;;  %v506_v27 = vld [vmem:[#allocation5 + $0xb80] sm:$0xff] }
 0x11d   :  { %2635 = vmatpush1.bf16.msra.mxu0 %v4390_v33  ;;  %v4440_v33 = vcombine.low %v491_v20, %v495_v21  ;;  %v4454_v40 = vcombine.low %v506_v27, %v510_v29  ;;  %v180_v20 = vld [vmem:[#allocation5 + $0x150] sm:$0xff] }
 0x11e   :  { %2636 = vmatprep.subr.bf16.mxu0 %v4399_v35  ;;  %v4449_v35 = vcombine.high %v499_v30, %v503_v31  ;;  %v184_v21 = vld [vmem:[#allocation5 + $0x170] sm:$0xff] }
 0x11f   :  { %2805 = vmatpush1.bf16.msra.mxu1 %v4384_v34  ;;  %v4455_v34 = vcombine.high %v506_v27, %v510_v29  ;;  %v4131_v27 = vcombine.high %v180_v20, %v184_v21 }
 0x120   :  { %2806 = vmatprep.subr.bf16.mxu1 %v4393_v36  ;;  %v514_v36 = vld [vmem:[#allocation5 + $0xbc0] sm:$0xff] }
 0x121   :  { %2637 = vmatpush1.bf16.msra.mxu0 %v4398_v41  ;;  %v4448_v41 = vcombine.low %v499_v30, %v503_v31  ;;  %v4462_v50 = vcombine.low %v514_v36, %v518_v37  ;;  %v188_v30 = vld [vmem:[#allocation5 + $0x190] sm:$0xff] }
 0x122   :  { %2638 = vmatprep.subr.bf16.mxu0 %v4407_v45  ;;  %v4457_v45 = vcombine.high %v507_v38, %v511_v39  ;;  %v192_v31 = vld [vmem:[#allocation5 + $0x1b0] sm:$0xff] }
 0x123   :  { %2807 = vmatpush1.bf16.msra.mxu1 %v4392_v43  ;;  %v4463_v43 = vcombine.high %v514_v36, %v518_v37  ;;  %v149_v36 = vld [vmem:[#allocation5 + $0x58] sm:$0xff] }
 0x124   :  { %2808 = vmatprep.subr.bf16.mxu1 %v4401_v46  ;;  %v140_v46 = vld [vmem:[#allocation5 + $0x10] sm:$0xff]  ;;  %v153_v37 = vld [vmem:[#allocation5 + $0x78] sm:$0xff] }
 0x125   :  { %2639 = vmatpush1.bf16.msra.mxu0 %v4406_v51  ;;  %v121_v51 = vld [vmem:[#allocation2 + $0x20] sm:$0xff] }
 0x126   :  { %2640 = vmatprep.subr.bf16.mxu0 %v4415_v53  ;;  %v4456_v53 = vcombine.low %v507_v38, %v511_v39  ;;  %v4138_v38 = vcombine.low %v188_v30, %v192_v31 }
 0x127   :  { %2809 = vmatpush1.bf16.msra.mxu1 %v4400_v52  ;;  %v128_v52 = vld [vmem:[#allocation2 + $0x58] sm:$0xff] }
 0x128   :  { %2810 = vmatprep.subr.bf16.mxu1 %v4409_v54  ;;  %v4091_v54 = vcombine.high %v140_v46, %v144_v47  ;;  %v5197_v58 = vpack.c.bf16 %v128_v52, %v121_v51  ;;  %v4100_v52 = vcombine.low %v149_v36, %v153_v37 }
 0x129   :  { %2641 = vmatpush1.bf16.msra.mxu0 %v4414_v59  ;;  %v523_v59 = vld [vmem:[#allocation5 + $0xc08] sm:$0xff] }
 0x12a   :  { %2642 = vmatprep.subr.bf16.mxu0 %v4423_v61  ;;  %v4090_v61 = vcombine.low %v140_v46, %v144_v47  ;;  %v157_v47 = vld [vmem:[#allocation5 + $0x98] sm:$0xff] }
 0x12b   :  { %2811 = vmatpush1.bf16.msra.mxu1 %v4408_v60  ;;  %v527_v60 = vld [vmem:[#allocation5 + $0xc28] sm:$0xff] }
 0x12c   :  { %2812 = vmatprep.subr.bf16.mxu1 %v4417_v62  ;;  %v4464_v62 = vcombine.low %v515_v48, %v519_v49  ;;  %v4473_v2 = vcombine.high %v523_v59, %v527_v60  ;;  %v161_v48 = vld [vmem:[#allocation5 + $0xb8] sm:$0xff] }
 0x12d   :  { %2643 = vmatpush1.bf16.msra.mxu0 %v4422_v5  ;;  %v524_v5 = vld [vmem:[#allocation5 + $0xc10] sm:$0xff] }
 0x12e   :  { %2644 = vmatprep.subr.bf16.mxu0 %v4431_v7  ;;  %v4098_v7 = vcombine.low %v148_v56, %v152_v57  ;;  %v212_v56 = vld [vmem:[#allocation5 + $0x250] sm:$0xff] }
 0x12f   :  { %2813 = vmatpush1.bf16.msra.mxu1 %v4416_v6  ;;  %v528_v6 = vld [vmem:[#allocation5 + $0xc30] sm:$0xff] }
 0x130   :  { %2814 = vmatprep.subr.bf16.mxu1 %v4425_v8  ;;  %v4472_v8 = vcombine.low %v523_v59, %v527_v60  ;;  %v4475_v12 = vcombine.high %v524_v5, %v528_v6  ;;  %v216_v57 = vld [vmem:[#allocation5 + $0x270] sm:$0xff]  ;;  %v165_v59 = vld [vmem:[#allocation5 + $0xd8] sm:$0xff] }
 0x131   :  { %2645 = vmatpush1.bf16.msra.mxu0 %v4430_v13  ;;  %v4106_v13 = vcombine.low %v156_v3, %v160_v4  ;;  %v169_v60 = vld [vmem:[#allocation5 + $0xf8] sm:$0xff]  ;;  %v220_v3 = vld [vmem:[#allocation5 + $0x290] sm:$0xff] }
 0x132   :  { %2646 = vmatprep.subr.bf16.mxu0 %v4439_v15  ;;  %v172_v15 = vld [vmem:[#allocation5 + $0x110] sm:$0xff] }
 0x133   :  { %2815 = vmatpush1.bf16.msra.mxu1 %v4424_v14  ;;  %v4115_v14 = vcombine.high %v164_v10, %v168_v11  ;;  %v224_v4 = vld [vmem:[#allocation5 + $0x2b0] sm:$0xff] }
 0x134   :  { %2816 = vmatprep.subr.bf16.mxu1 %v4433_v16  ;;  %v176_v16 = vld [vmem:[#allocation5 + $0x130] sm:$0xff] }
 0x135   :  { %2647 = vmatpush1.bf16.msra.mxu0 %v4438_v22  ;;  %v4123_v19 = vcombine.high %v172_v15, %v176_v16  ;;  %v141_v22 = vld [vmem:[#allocation5 + $0x18] sm:$0xff]  ;;  %v228_v10 = vld [vmem:[#allocation5 + $0x2d0] sm:$0xff] }
 0x136   :  { %2648 = vmatprep.subr.bf16.mxu0 %v4447_v25  ;;  %v4122_v25 = vcombine.low %v172_v15, %v176_v16  ;;  %v232_v11 = vld [vmem:[#allocation5 + $0x2f0] sm:$0xff] }
 0x137   :  { %2817 = vmatpush1.bf16.msra.mxu1 %v4432_v23  ;;  %v145_v23 = vld [vmem:[#allocation5 + $0x38] sm:$0xff]  ;;  %v4179_v16 = vcombine.high %v228_v10, %v232_v11 }
 0x138   :  { %2818 = vmatprep.subr.bf16.mxu1 %v4441_v26  ;;  %v4474_v26 = vcombine.low %v524_v5, %v528_v6  ;;  %v4093_v29 = vcombine.high %v141_v22, %v145_v23  ;;  %v4092_v39 = vcombine.low %v141_v22, %v145_v23  ;;  %v173_v5 = vld [vmem:[#allocation5 + $0x118] sm:$0xff]  ;;  %v4178_v23 = vcombine.low %v228_v10, %v232_v11 }
 0x139   :  { %2649 = vmatpush1.bf16.msra.mxu0 %v4446_v32  ;;  %v4130_v32 = vcombine.low %v180_v20, %v184_v21  ;;  %v177_v6 = vld [vmem:[#allocation5 + $0x138] sm:$0xff]  ;;  %v240_v20 = vld [vmem:[#allocation5 + $0x330] sm:$0xff] }
 0x13a   :  { %2650 = vmatprep.subr.bf16.mxu0 %v4455_v34  ;;  %v196_v34 = vld [vmem:[#allocation5 + $0x1d0] sm:$0xff]  ;;  %v4124_v15 = vcombine.low %v173_v5, %v177_v6  ;;  %v189_v21 = vld [vmem:[#allocation5 + $0x198] sm:$0xff] }
 0x13b   :  { %2819 = vmatpush1.bf16.msra.mxu1 %v4440_v33  ;;  %v4139_v33 = vcombine.high %v188_v30, %v192_v31  ;;  %v193_v22 = vld [vmem:[#allocation5 + $0x1b8] sm:$0xff]  ;;  %v248_v30 = vld [vmem:[#allocation5 + $0x370] sm:$0xff] }
 0x13c   :  { %2820 = vmatprep.subr.bf16.mxu1 %v4449_v35  ;;  %v200_v35 = vld [vmem:[#allocation5 + $0x1f0] sm:$0xff]  ;;  %v197_v31 = vld [vmem:[#allocation5 + $0x1d8] sm:$0xff] }
 0x13d   :  { %2651 = vmatpush1.bf16.msra.mxu0 %v4454_v40  ;;  %v4147_v40 = vcombine.high %v196_v34, %v200_v35 }
 0x13e   :  { %2652 = vmatprep.subr.bf16.mxu0 %v4463_v43  ;;  %v204_v43 = vld [vmem:[#allocation5 + $0x210] sm:$0xff] }
 0x13f   :  { %2821 = vmatpush1.bf16.msra.mxu1 %v4448_v41  ;;  %v4101_v41 = vcombine.high %v149_v36, %v153_v37  ;;  %v252_v37 = vld [vmem:[#allocation5 + $0x390] sm:$0xff] }
 0x140   :  { %2822 = vmatprep.subr.bf16.mxu1 %v4457_v45  ;;  %v208_v45 = vld [vmem:[#allocation5 + $0x230] sm:$0xff] }
 0x141   :  { %2653 = vmatpush1.bf16.msra.mxu0 %v4462_v50  ;;  %v4146_v50 = vcombine.low %v196_v34, %v200_v35  ;;  %v4140_v34 = vcombine.low %v189_v21, %v193_v22 }
 0x142   :  { %2880 = vmatprep.subr.bf16.mxu0 %v4091_v54 }
 0x143   :  { %2823 = vmatpush1.bf16.msra.mxu1 %v4456_v53  ;;  %v4155_v53 = vcombine.high %v204_v43, %v208_v45 }
 0x144   :  { %2824 = vmatprep.subr.bf16.mxu1 %v4465_v55  ;;  %2655 = vmatmul.mubr.bf16.vlgmr.msra.gmra.mrb[0].mxu0 %v5197_v58  ;;  %v4109_v55 = vcombine.high %v157_v47, %v161_v48 }
 0x145   :  { %2881 = vmatpush1.bf16.msra.mxu0 %v4090_v61  ;;  %2912 = vmatprep.mubr.bf16.mxu0 %v5177_v1  ;;  %v4154_v61 = vcombine.low %v204_v43, %v208_v45 }
 0x146   :  { %2882 = vmatprep.subr.bf16.mxu0 %v4099_v63  ;;  %v4163_v63 = vcombine.high %v212_v56, %v216_v57 }
 0x147   :  { %2825 = vmatpush1.bf16.msra.mxu1 %v4464_v62  ;;  %v4108_v62 = vcombine.low %v157_v47, %v161_v48  ;;  %v260_v48 = vld [vmem:[#allocation5 + $0x3d0] sm:$0xff] }
 0x148   :  { %2837 = vmatprep.subr.bf16.mxu1 %v4473_v2  ;;  %v4117_v2 = vcombine.high %v165_v59, %v169_v60 }
 0x149   :  { %2883 = vmatpush1.bf16.msra.mxu0 %v4098_v7  ;;  %v4162_v7 = vcombine.low %v212_v56, %v216_v57 }
 0x14a   :  { %2827 = vmatmul.mubr.bf16.vlgmr.msra.gmra.mrb[4].mxu1 %v5197_v58  ;;  %2884 = vmatprep.subr.bf16.mxu0 %v4107_v9  ;;  %v4125_v9 = vcombine.high %v173_v5, %v177_v6  ;;  %v276_v6 = vld [vmem:[#allocation5 + $0x450] sm:$0xff] }
 0x14b   :  { %2838 = vmatpush1.bf16.msra.mxu1 %v4472_v8  ;;  %2869 = vmatprep.mubr.bf16.mxu1 %v5035_v0  ;;  %v4116_v8 = vcombine.low %v165_v59, %v169_v60  ;;  %v268_v60 = vld [vmem:[#allocation5 + $0x410] sm:$0xff] }
 0x14c   :  { %3009 = vmatprep.subr.bf16.mxu1 %v4475_v12  ;;  %v181_v12 = vld [vmem:[#allocation5 + $0x158] sm:$0xff] }
 0x14d   :  { %2885 = vmatpush1.bf16.msra.mxu0 %v4106_v13  ;;  %v185_v13 = vld [vmem:[#allocation5 + $0x178] sm:$0xff] }
 0x14e   :  { %2886 = vmatprep.subr.bf16.mxu0 %v4115_v14  ;;  %v4170_v14 = vcombine.low %v220_v3, %v224_v4 }
 0x151   :  { %2887 = vmatpush1.bf16.msra.mxu0 %v4114_v17  ;;  %v4133_v17 = vcombine.high %v181_v12, %v185_v13 }
 0x152   :  { %2888 = vmatprep.subr.bf16.mxu0 %v4123_v19  ;;  %v236_v19 = vld [vmem:[#allocation5 + $0x310] sm:$0xff] }
 0x155   :  { %2889 = vmatpush1.bf16.msra.mxu0 %v4122_v25  ;;  %v4132_v25 = vcombine.low %v181_v12, %v185_v13  ;;  %v284_v13 = vld [vmem:[#allocation5 + $0x490] sm:$0xff] }
 0x156   :  { %4479 = vmatmul.mubr.msk.bf16.vlgmr.msra.gmra.mrb[4].mxu1 %vm2532_vm0, %v5173_v18  ;;  %2890 = vmatprep.subr.bf16.mxu0 %v4131_v27  ;;  %v4141_v27 = vcombine.high %v189_v21, %v193_v22  ;;  %v292_v22 = vld [vmem:[#allocation5 + $0x4d0] sm:$0xff] }
 0x157   :  { %3010 = vmatpush1.bf16.msra.mxu1 %v4474_v26  ;;  %3041 = vmatprep.mubr.bf16.mxu1 %v5035_v0  ;;  %v4187_v26 = vcombine.high %v236_v19, %v240_v20 }
 0x158   :  { %3052 = vmatprep.subr.bf16.mxu1 %v4093_v29  ;;  %v244_v29 = vld [vmem:[#allocation5 + $0x350] sm:$0xff] }
 0x159   :  { %2891 = vmatpush1.bf16.msra.mxu0 %v4130_v32  ;;  %v201_v32 = vld [vmem:[#allocation5 + $0x1f8] sm:$0xff]  ;;  %v4195_v35 = vcombine.high %v244_v29, %v248_v30 }
 0x15a   :  { %2892 = vmatprep.subr.bf16.mxu0 %v4139_v33  ;;  %v4186_v33 = vcombine.low %v236_v19, %v240_v20  ;;  %v4149_v36 = vcombine.high %v197_v31, %v201_v32  ;;  %v4148_v43 = vcombine.low %v197_v31, %v201_v32  ;;  %v300_v32 = vld [vmem:[#allocation5 + $0x510] sm:$0xff] }
 0x15d   :  { %v5206_v46 = vpop.f32.mrb[0].mxu1  ;;  %2893 = vmatpush1.bf16.msra.mxu0 %v4138_v38  ;;  %v256_v38 = vld [vmem:[#allocation5 + $0x3b0] sm:$0xff] }
 0x15e   :  { %v5208_v49 = vpop.f32.mrb[1].mxu1  ;;  %4480 = vmatmul.mubr.msk.bf16.vlgmr.msra.gmra.mrb[8].mxu1 %vm2532_vm0, %v5173_v18  ;;  %2894 = vmatprep.subr.bf16.mxu0 %v4147_v40  ;;  %v209_v40 = vld [vmem:[#allocation5 + $0x238] sm:$0xff]  ;;  %v4203_v45 = vcombine.high %v252_v37, %v256_v38 }
 0x15f   :  { %3053 = vmatpush1.bf16.msra.mxu1 %v4092_v39  ;;  %v5212_v51 = vpop.f32.mrb[2].mxu1  ;;  %3084 = vmatprep.mubr.bf16.mxu1 %v5177_v1  ;;  %v4171_v1 = vcombine.high %v220_v3, %v224_v4  ;;  %v205_v39 = vld [vmem:[#allocation5 + $0x218] sm:$0xff] }
 0x160   :  { %v5214_v54 = vpop.f32.mrb[3].mxu1  ;;  %3054 = vmatprep.subr.bf16.mxu1 %v4101_v41  ;;  %v4194_v41 = vcombine.low %v244_v29, %v248_v30  ;;  %v4157_v47 = vcombine.high %v205_v39, %v209_v40  ;;  %v4156_v56 = vcombine.low %v205_v39, %v209_v40  ;;  %v308_v40 = vld [vmem:[#allocation5 + $0x550] sm:$0xff] }
 0x161   :  { %2895 = vmatpush1.bf16.msra.mxu0 %v4146_v50  ;;  %v264_v50 = vld [vmem:[#allocation5 + $0x3f0] sm:$0xff] }
 0x162   :  { %2896 = vmatprep.subr.bf16.mxu0 %v4155_v53  ;;  %v217_v53 = vld [vmem:[#allocation5 + $0x278] sm:$0xff]  ;;  %v4211_v57 = vcombine.high %v260_v48, %v264_v50 }
 0x163   :  { %3055 = vmatpush1.bf16.msra.mxu1 %v4100_v52  ;;  %v213_v52 = vld [vmem:[#allocation5 + $0x258] sm:$0xff] }
 0x164   :  { %3056 = vmatprep.subr.bf16.mxu1 %v4109_v55  ;;  %v4202_v55 = vcombine.low %v252_v37, %v256_v38  ;;  %v4165_v59 = vcombine.high %v213_v52, %v217_v53  ;;  %v4164_v3 = vcombine.low %v213_v52, %v217_v53  ;;  %v316_v53 = vld [vmem:[#allocation5 + $0x590] sm:$0xff] }
 0x165   :  { %2897 = vmatpush1.bf16.msra.mxu0 %v4154_v61  ;;  %v272_v61 = vld [vmem:[#allocation5 + $0x430] sm:$0xff] }
 0x166   :  { %2898 = vmatprep.subr.bf16.mxu0 %v4163_v63  ;;  %v225_v63 = vld [vmem:[#allocation5 + $0x2b8] sm:$0xff]  ;;  %v4219_v4 = vcombine.high %v268_v60, %v272_v61 }
 0x167   :  { %3057 = vmatpush1.bf16.msra.mxu1 %v4108_v62  ;;  %v221_v62 = vld [vmem:[#allocation5 + $0x298] sm:$0xff] }
 0x168   :  { %3058 = vmatprep.subr.bf16.mxu1 %v4117_v2  ;;  %v4210_v2 = vcombine.low %v260_v48, %v264_v50  ;;  %v4173_v5 = vcombine.high %v221_v62, %v225_v63  ;;  %v4172_v10 = vcombine.low %v221_v62, %v225_v63  ;;  %v324_v63 = vld [vmem:[#allocation5 + $0x5d0] sm:$0xff] }
 0x169   :  { %2899 = vmatpush1.bf16.msra.mxu0 %v4162_v7  ;;  %v280_v7 = vld [vmem:[#allocation5 + $0x470] sm:$0xff] }
 0x16a   :  { %2900 = vmatprep.subr.bf16.mxu0 %v4171_v1  ;;  %v233_v1 = vld [vmem:[#allocation5 + $0x2f8] sm:$0xff]  ;;  %v4227_v11 = vcombine.high %v276_v6, %v280_v7 }
 0x16b   :  { %3059 = vmatpush1.bf16.msra.mxu1 %v4116_v8  ;;  %v229_v8 = vld [vmem:[#allocation5 + $0x2d8] sm:$0xff] }
 0x16c   :  { %3060 = vmatprep.subr.bf16.mxu1 %v4125_v9  ;;  %v4218_v9 = vcombine.low %v268_v60, %v272_v61  ;;  %v4181_v12 = vcombine.high %v229_v8, %v233_v1  ;;  %v4180_v19 = vcombine.low %v229_v8, %v233_v1  ;;  %v332_v1 = vld [vmem:[#allocation5 + $0x610] sm:$0xff] }
 0x16d   :  { %2901 = vmatpush1.bf16.msra.mxu0 %v4170_v14  ;;  %v288_v14 = vld [vmem:[#allocation5 + $0x4b0] sm:$0xff] }
 0x16e   :  { %2902 = vmatprep.subr.bf16.mxu0 %v4179_v16  ;;  %v241_v16 = vld [vmem:[#allocation5 + $0x338] sm:$0xff]  ;;  %v4235_v20 = vcombine.high %v284_v13, %v288_v14 }
 0x16f   :  { %3061 = vmatpush1.bf16.msra.mxu1 %v4124_v15  ;;  %v237_v15 = vld [vmem:[#allocation5 + $0x318] sm:$0xff] }
 0x170   :  { %3062 = vmatprep.subr.bf16.mxu1 %v4133_v17  ;;  %v4226_v17 = vcombine.low %v276_v6, %v280_v7  ;;  %v4189_v21 = vcombine.high %v237_v15, %v241_v16  ;;  %v4188_v29 = vcombine.low %v237_v15, %v241_v16  ;;  %v340_v16 = vld [vmem:[#allocation5 + $0x650] sm:$0xff] }
 0x171   :  { %2903 = vmatpush1.bf16.msra.mxu0 %v4178_v23  ;;  %v296_v23 = vld [vmem:[#allocation5 + $0x4f0] sm:$0xff] }
 0x172   :  { %2904 = vmatprep.subr.bf16.mxu0 %v4187_v26  ;;  %v249_v26 = vld [vmem:[#allocation5 + $0x378] sm:$0xff]  ;;  %v4243_v30 = vcombine.high %v292_v22, %v296_v23 }
 0x173   :  { %3063 = vmatpush1.bf16.msra.mxu1 %v4132_v25  ;;  %v245_v25 = vld [vmem:[#allocation5 + $0x358] sm:$0xff] }
 0x174   :  { %3064 = vmatprep.subr.bf16.mxu1 %v4141_v27  ;;  %v4234_v27 = vcombine.low %v284_v13, %v288_v14  ;;  %v4197_v31 = vcombine.high %v245_v25, %v249_v26  ;;  %v4196_v37 = vcombine.low %v245_v25, %v249_v26  ;;  %v348_v25 = vld [vmem:[#allocation5 + $0x690] sm:$0xff] }
 0x175   :  { %2905 = vmatpush1.bf16.msra.mxu0 %v4186_v33  ;;  %v304_v33 = vld [vmem:[#allocation5 + $0x530] sm:$0xff] }
 0x176   :  { %2906 = vmatprep.subr.bf16.mxu0 %v4195_v35  ;;  %v257_v35 = vld [vmem:[#allocation5 + $0x3b8] sm:$0xff]  ;;  %v4251_v38 = vcombine.high %v300_v32, %v304_v33  ;;  %v352_v26 = vld [vmem:[#allocation5 + $0x6b0] sm:$0xff] }
 0x177   :  { %3065 = vmatpush1.bf16.msra.mxu1 %v4140_v34  ;;  %v253_v34 = vld [vmem:[#allocation5 + $0x398] sm:$0xff] }
 0x178   :  { %3066 = vmatprep.subr.bf16.mxu1 %v4149_v36  ;;  %v4242_v36 = vcombine.low %v292_v22, %v296_v23  ;;  %v4205_v39 = vcombine.high %v253_v34, %v257_v35  ;;  %v4204_v48 = vcombine.low %v253_v34, %v257_v35  ;;  %v360_v34 = vld [vmem:[#allocation5 + $0x6f0] sm:$0xff]  ;;  %v309_v35 = vld [vmem:[#allocation5 + $0x558] sm:$0xff] }
 0x179   :  { %2907 = vmatpush1.bf16.msra.mxu0 %v4194_v41  ;;  %v312_v41 = vld [vmem:[#allocation5 + $0x570] sm:$0xff] }
 0x17a   :  { %2908 = vmatprep.subr.bf16.mxu0 %v4203_v45  ;;  %v265_v45 = vld [vmem:[#allocation5 + $0x3f8] sm:$0xff]  ;;  %v4259_v50 = vcombine.high %v308_v40, %v312_v41 }
 0x17b   :  { %3067 = vmatpush1.bf16.msra.mxu1 %v4148_v43  ;;  %v261_v43 = vld [vmem:[#allocation5 + $0x3d8] sm:$0xff] }
 0x17c   :  { %3068 = vmatprep.subr.bf16.mxu1 %v4157_v47  ;;  %v4250_v47 = vcombine.low %v300_v32, %v304_v33  ;;  %v4213_v52 = vcombine.high %v261_v43, %v265_v45  ;;  %v4212_v60 = vcombine.low %v261_v43, %v265_v45  ;;  %v356_v33 = vld [vmem:[#allocation5 + $0x6d0] sm:$0xff]  ;;  %v317_v45 = vld [vmem:[#allocation5 + $0x598] sm:$0xff] }
 0x17d   :  { %2909 = vmatpush1.bf16.msra.mxu0 %v4202_v55  ;;  %v320_v55 = vld [vmem:[#allocation5 + $0x5b0] sm:$0xff] }
 0x17e   :  { %2910 = vmatprep.subr.bf16.mxu0 %v4211_v57  ;;  %v273_v57 = vld [vmem:[#allocation5 + $0x438] sm:$0xff]  ;;  %v4267_v61 = vcombine.high %v316_v53, %v320_v55  ;;  %v368_v43 = vld [vmem:[#allocation5 + $0x730] sm:$0xff] }
 0x17f   :  { %3069 = vmatpush1.bf16.msra.mxu1 %v4156_v56  ;;  %v269_v56 = vld [vmem:[#allocation5 + $0x418] sm:$0xff] }
 0x180   :  { %3070 = vmatprep.subr.bf16.mxu1 %v4165_v59  ;;  %v4258_v59 = vcombine.low %v308_v40, %v312_v41  ;;  %v4221_v62 = vcombine.high %v269_v56, %v273_v57  ;;  %v4220_v6 = vcombine.low %v269_v56, %v273_v57  ;;  %v364_v41 = vld [vmem:[#allocation5 + $0x710] sm:$0xff]  ;;  %v325_v57 = vld [vmem:[#allocation5 + $0x5d8] sm:$0xff] }
 0x181   :  { %2911 = vmatpush1.bf16.msra.mxu0 %v4210_v2  ;;  %v328_v2 = vld [vmem:[#allocation5 + $0x5f0] sm:$0xff] }
 0x182   :  { %2923 = vmatprep.subr.bf16.mxu0 %v4219_v4  ;;  %v281_v4 = vld [vmem:[#allocation5 + $0x478] sm:$0xff]  ;;  %v4275_v7 = vcombine.high %v324_v63, %v328_v2  ;;  %v376_v56 = vld [vmem:[#allocation5 + $0x770] sm:$0xff] }
 0x183   :  { %3071 = vmatpush1.bf16.msra.mxu1 %v4164_v3  ;;  %v277_v3 = vld [vmem:[#allocation5 + $0x458] sm:$0xff] }
 0x184   :  { %3072 = vmatprep.subr.bf16.mxu1 %v4173_v5  ;;  %2913 = vmatmul.mubr.bf16.vlgmr.msra.gmra.mrb[4].mxu0 %v5181_v24  ;;  %v4266_v5 = vcombine.low %v316_v53, %v320_v55  ;;  %v4229_v8 = vcombine.high %v277_v3, %v281_v4  ;;  %v4228_v13 = vcombine.low %v277_v3, %v281_v4  ;;  %v372_v55 = vld [vmem:[#allocation5 + $0x750] sm:$0xff]  ;;  %v333_v4 = vld [vmem:[#allocation5 + $0x618] sm:$0xff] }
 0x185   :  { %2924 = vmatpush1.bf16.msra.mxu0 %v4218_v9  ;;  %2955 = vmatprep.mubr.bf16.mxu0 %v5183_v28  ;;  %v336_v9 = vld [vmem:[#allocation5 + $0x630] sm:$0xff] }
 0x186   :  { %2925 = vmatprep.subr.bf16.mxu0 %v4227_v11  ;;  %v289_v11 = vld [vmem:[#allocation5 + $0x4b8] sm:$0xff]  ;;  %v4283_v14 = vcombine.high %v332_v1, %v336_v9  ;;  %v384_v3 = vld [vmem:[#allocation5 + $0x7b0] sm:$0xff] }
 0x187   :  { %3073 = vmatpush1.bf16.msra.mxu1 %v4172_v10  ;;  %v285_v10 = vld [vmem:[#allocation5 + $0x498] sm:$0xff] }
 0x188   :  { %3074 = vmatprep.subr.bf16.mxu1 %v4181_v12  ;;  %v4274_v12 = vcombine.low %v324_v63, %v328_v2  ;;  %v4237_v15 = vcombine.high %v285_v10, %v289_v11  ;;  %v4236_v22 = vcombine.low %v285_v10, %v289_v11  ;;  %v380_v2 = vld [vmem:[#allocation5 + $0x790] sm:$0xff]  ;;  %v341_v11 = vld [vmem:[#allocation5 + $0x658] sm:$0xff] }
 0x189   :  { %2926 = vmatpush1.bf16.msra.mxu0 %v4226_v17  ;;  %v344_v17 = vld [vmem:[#allocation5 + $0x670] sm:$0xff] }
 0x18a   :  { %2927 = vmatprep.subr.bf16.mxu0 %v4235_v20  ;;  %v297_v20 = vld [vmem:[#allocation5 + $0x4f8] sm:$0xff]  ;;  %v392_v10 = vld [vmem:[#allocation5 + $0x7f0] sm:$0xff] }
 0x18b   :  { %3075 = vmatpush1.bf16.msra.mxu1 %v4180_v19  ;;  %v293_v19 = vld [vmem:[#allocation5 + $0x4d8] sm:$0xff] }
 0x18c   :  { %3076 = vmatprep.subr.bf16.mxu1 %v4189_v21  ;;  %v4282_v21 = vcombine.low %v332_v1, %v336_v9  ;;  %v4245_v23 = vcombine.high %v293_v19, %v297_v20  ;;  %v388_v9 = vld [vmem:[#allocation5 + $0x7d0] sm:$0xff] }
 0x18d   :  { %2928 = vmatpush1.bf16.msra.mxu0 %v4234_v27  ;;  %v301_v27 = vld [vmem:[#allocation5 + $0x518] sm:$0xff] }
 0x18e   :  { %2929 = vmatprep.subr.bf16.mxu0 %v4243_v30  ;;  %v4290_v30 = vcombine.low %v340_v16, %v344_v17 }
 0x18f   :  { %3077 = vmatpush1.bf16.msra.mxu1 %v4188_v29  ;;  %v305_v29 = vld [vmem:[#allocation5 + $0x538] sm:$0xff] }
 0x190   :  { %3078 = vmatprep.subr.bf16.mxu1 %v4197_v31  ;;  %v4244_v31 = vcombine.low %v293_v19, %v297_v20  ;;  %v4253_v32 = vcombine.high %v301_v27, %v305_v29  ;;  %v400_v19 = vld [vmem:[#allocation5 + $0x830] sm:$0xff]  ;;  %v349_v20 = vld [vmem:[#allocation5 + $0x698] sm:$0xff] }
 0x191   :  { %2930 = vmatpush1.bf16.msra.mxu0 %v4242_v36  ;;  %v313_v36 = vld [vmem:[#allocation5 + $0x578] sm:$0xff] }
 0x192   :  { %2931 = vmatprep.subr.bf16.mxu0 %v4251_v38  ;;  %v4252_v38 = vcombine.low %v301_v27, %v305_v29  ;;  %v4261_v40 = vcombine.high %v309_v35, %v313_v36  ;;  %v408_v27 = vld [vmem:[#allocation5 + $0x870] sm:$0xff]  ;;  %v357_v29 = vld [vmem:[#allocation5 + $0x6d8] sm:$0xff] }
 0x193   :  { %3079 = vmatpush1.bf16.msra.mxu1 %v4196_v37  ;;  %v4298_v37 = vcombine.low %v348_v25, %v352_v26 }
 0x194   :  { %3080 = vmatprep.subr.bf16.mxu1 %v4205_v39  ;;  %v4307_v39 = vcombine.high %v356_v33, %v360_v34 }
 0x195   :  { %2932 = vmatpush1.bf16.msra.mxu0 %v4250_v47  ;;  %v321_v47 = vld [vmem:[#allocation5 + $0x5b8] sm:$0xff] }
 0x196   :  { %2933 = vmatprep.subr.bf16.mxu0 %v4259_v50  ;;  %v4260_v50 = vcombine.low %v309_v35, %v313_v36  ;;  %v4269_v53 = vcombine.high %v317_v45, %v321_v47  ;;  %v416_v35 = vld [vmem:[#allocation5 + $0x8b0] sm:$0xff]  ;;  %v365_v36 = vld [vmem:[#allocation5 + $0x718] sm:$0xff] }
 0x197   :  { %3081 = vmatpush1.bf16.msra.mxu1 %v4204_v48  ;;  %v4306_v48 = vcombine.low %v356_v33, %v360_v34  ;;  %v412_v34 = vld [vmem:[#allocation5 + $0x890] sm:$0xff] }
 0x198   :  { %3082 = vmatprep.subr.bf16.mxu1 %v4213_v52  ;;  %v4315_v52 = vcombine.high %v364_v41, %v368_v43 }
 0x199   :  { %2934 = vmatpush1.bf16.msra.mxu0 %v4258_v59  ;;  %v329_v59 = vld [vmem:[#allocation5 + $0x5f8] sm:$0xff] }
 0x19a   :  { %2935 = vmatprep.subr.bf16.mxu0 %v4267_v61  ;;  %v4268_v61 = vcombine.low %v317_v45, %v321_v47  ;;  %v4277_v63 = vcombine.high %v325_v57, %v329_v59  ;;  %v424_v45 = vld [vmem:[#allocation5 + $0x8f0] sm:$0xff]  ;;  %v373_v47 = vld [vmem:[#allocation5 + $0x758] sm:$0xff] }
 0x19b   :  { %3083 = vmatpush1.bf16.msra.mxu1 %v4212_v60  ;;  %v4314_v60 = vcombine.low %v364_v41, %v368_v43  ;;  %v420_v43 = vld [vmem:[#allocation5 + $0x8d0] sm:$0xff] }
 0x19c   :  { %3095 = vmatprep.subr.bf16.mxu1 %v4221_v62  ;;  %v4323_v62 = vcombine.high %v372_v55, %v376_v56 }
 0x19d   :  { %2936 = vmatpush1.bf16.msra.mxu0 %v4266_v5  ;;  %v337_v5 = vld [vmem:[#allocation5 + $0x638] sm:$0xff] }
 0x19e   :  { %3085 = vmatmul.mubr.bf16.vlgmr.msra.gmra.mrb[12].mxu1 %v5181_v24  ;;  %2937 = vmatprep.subr.bf16.mxu0 %v4275_v7  ;;  %v4291_v24 = vcombine.high %v340_v16, %v344_v17  ;;  %v4276_v7 = vcombine.low %v325_v57, %v329_v59  ;;  %v4285_v1 = vcombine.high %v333_v4, %v337_v5  ;;  %v396_v17 = vld [vmem:[#allocation5 + $0x810] sm:$0xff]  ;;  %v381_v59 = vld [vmem:[#allocation5 + $0x798] sm:$0xff] }
 0x19f   :  { %3096 = vmatpush1.bf16.msra.mxu1 %v4220_v6  ;;  %3127 = vmatprep.mubr.bf16.mxu1 %v5183_v28  ;;  %v4299_v28 = vcombine.high %v348_v25, %v352_v26  ;;  %v4322_v6 = vcombine.low %v372_v55, %v376_v56  ;;  %v404_v26 = vld [vmem:[#allocation5 + $0x850] sm:$0xff] }
 0x1a0   :  { %3097 = vmatprep.subr.bf16.mxu1 %v4229_v8  ;;  %v4331_v8 = vcombine.high %v380_v2, %v384_v3  ;;  %v428_v56 = vld [vmem:[#allocation5 + $0x910] sm:$0xff] }
 0x1a1   :  { %2938 = vmatpush1.bf16.msra.mxu0 %v4274_v12  ;;  %v345_v12 = vld [vmem:[#allocation5 + $0x678] sm:$0xff]  ;;  %v432_v57 = vld [vmem:[#allocation5 + $0x930] sm:$0xff] }
 0x1a2   :  { %2939 = vmatprep.subr.bf16.mxu0 %v4283_v14  ;;  %v4284_v14 = vcombine.low %v333_v4, %v337_v5  ;;  %v4293_v16 = vcombine.high %v341_v11, %v345_v12  ;;  %v440_v4 = vld [vmem:[#allocation5 + $0x970] sm:$0xff]  ;;  %v389_v5 = vld [vmem:[#allocation5 + $0x7d8] sm:$0xff] }
 0x1a3   :  { %3098 = vmatpush1.bf16.msra.mxu1 %v4228_v13  ;;  %v4330_v13 = vcombine.low %v380_v2, %v384_v3  ;;  %v436_v3 = vld [vmem:[#allocation5 + $0x950] sm:$0xff] }
 0x1a4   :  { %3099 = vmatprep.subr.bf16.mxu1 %v4237_v15  ;;  %v4339_v15 = vcombine.high %v388_v9, %v392_v10 }
 0x1a5   :  { %2940 = vmatpush1.bf16.msra.mxu0 %v4282_v21  ;;  %v353_v21 = vld [vmem:[#allocation5 + $0x6b8] sm:$0xff] }
 0x1a6   :  { %2941 = vmatprep.subr.bf16.mxu0 %v4291_v24  ;;  %v4292_v24 = vcombine.low %v341_v11, %v345_v12  ;;  %v4301_v25 = vcombine.high %v349_v20, %v353_v21  ;;  %v448_v11 = vld [vmem:[#allocation5 + $0x9b0] sm:$0xff]  ;;  %v397_v12 = vld [vmem:[#allocation5 + $0x818] sm:$0xff] }
 0x1a7   :  { %3100 = vmatpush1.bf16.msra.mxu1 %v4236_v22  ;;  %v4338_v22 = vcombine.low %v388_v9, %v392_v10  ;;  %v444_v10 = vld [vmem:[#allocation5 + $0x990] sm:$0xff] }
 0x1a8   :  { %3101 = vmatprep.subr.bf16.mxu1 %v4245_v23  ;;  %v4347_v23 = vcombine.high %v396_v17, %v400_v19 }
 0x1a9   :  { %2942 = vmatpush1.bf16.msra.mxu0 %v4290_v30  ;;  %v361_v30 = vld [vmem:[#allocation5 + $0x6f8] sm:$0xff] }
 0x1aa   :  { %2943 = vmatprep.subr.bf16.mxu0 %v4299_v28  ;;  %v4300_v28 = vcombine.low %v349_v20, %v353_v21  ;;  %v4309_v33 = vcombine.high %v357_v29, %v361_v30  ;;  %v456_v20 = vld [vmem:[#allocation5 + $0x9f0] sm:$0xff]  ;;  %v405_v21 = vld [vmem:[#allocation5 + $0x858] sm:$0xff] }
 0x1ab   :  { %3102 = vmatpush1.bf16.msra.mxu1 %v4244_v31  ;;  %v4346_v31 = vcombine.low %v396_v17, %v400_v19  ;;  %v452_v19 = vld [vmem:[#allocation5 + $0x9d0] sm:$0xff] }
 0x1ac   :  { %3103 = vmatprep.subr.bf16.mxu1 %v4253_v32  ;;  %v4355_v32 = vcombine.high %v404_v26, %v408_v27 }
 0x1ad   :  { %2944 = vmatpush1.bf16.msra.mxu0 %v4298_v37  ;;  %v369_v37 = vld [vmem:[#allocation5 + $0x738] sm:$0xff] }
 0x1ae   :  { %2945 = vmatprep.subr.bf16.mxu0 %v4307_v39  ;;  %v4308_v39 = vcombine.low %v357_v29, %v361_v30  ;;  %v4317_v41 = vcombine.high %v365_v36, %v369_v37  ;;  %v464_v29 = vld [vmem:[#allocation5 + $0xa30] sm:$0xff]  ;;  %v413_v30 = vld [vmem:[#allocation5 + $0x898] sm:$0xff] }
 0x1af   :  { %3104 = vmatpush1.bf16.msra.mxu1 %v4252_v38  ;;  %v4354_v38 = vcombine.low %v404_v26, %v408_v27  ;;  %v460_v27 = vld [vmem:[#allocation5 + $0xa10] sm:$0xff] }
 0x1b0   :  { %3105 = vmatprep.subr.bf16.mxu1 %v4261_v40  ;;  %v4363_v40 = vcombine.high %v412_v34, %v416_v35 }
 0x1b1   :  { %2946 = vmatpush1.bf16.msra.mxu0 %v4306_v48  ;;  %v377_v48 = vld [vmem:[#allocation5 + $0x778] sm:$0xff] }
 0x1b2   :  { %2947 = vmatprep.subr.bf16.mxu0 %v4315_v52  ;;  %v4316_v52 = vcombine.low %v365_v36, %v369_v37  ;;  %v4325_v55 = vcombine.high %v373_v47, %v377_v48  ;;  %v472_v36 = vld [vmem:[#allocation5 + $0xa70] sm:$0xff]  ;;  %v421_v37 = vld [vmem:[#allocation5 + $0x8d8] sm:$0xff] }
 0x1b3   :  { %3106 = vmatpush1.bf16.msra.mxu1 %v4260_v50  ;;  %v4362_v50 = vcombine.low %v412_v34, %v416_v35  ;;  %v468_v35 = vld [vmem:[#allocation5 + $0xa50] sm:$0xff] }
 0x1b4   :  { %3107 = vmatprep.subr.bf16.mxu1 %v4269_v53  ;;  %v4371_v53 = vcombine.high %v420_v43, %v424_v45 }
 0x1b5   :  { %2948 = vmatpush1.bf16.msra.mxu0 %v4314_v60  ;;  %v385_v60 = vld [vmem:[#allocation5 + $0x7b8] sm:$0xff] }
 0x1b6   :  { %2949 = vmatprep.subr.bf16.mxu0 %v4323_v62  ;;  %v4324_v62 = vcombine.low %v373_v47, %v377_v48  ;;  %v4333_v2 = vcombine.high %v381_v59, %v385_v60  ;;  %v429_v47 = vld [vmem:[#allocation5 + $0x918] sm:$0xff] }
 0x1b7   :  { %3108 = vmatpush1.bf16.msra.mxu1 %v4268_v61  ;;  %v4370_v61 = vcombine.low %v420_v43, %v424_v45  ;;  %v476_v43 = vld [vmem:[#allocation5 + $0xa90] sm:$0xff]  ;;  %v433_v48 = vld [vmem:[#allocation5 + $0x938] sm:$0xff] }
 0x1b8   :  { %3109 = vmatprep.subr.bf16.mxu1 %v4277_v63  ;;  %v4379_v63 = vcombine.high %v428_v56, %v432_v57  ;;  %v480_v45 = vld [vmem:[#allocation5 + $0xab0] sm:$0xff] }
 0x1b9   :  { %2950 = vmatpush1.bf16.msra.mxu0 %v4322_v6  ;;  %v393_v6 = vld [vmem:[#allocation5 + $0x7f8] sm:$0xff] }
 0x1ba   :  { %2951 = vmatprep.subr.bf16.mxu0 %v4331_v8  ;;  %v4332_v8 = vcombine.low %v381_v59, %v385_v60  ;;  %v4341_v9 = vcombine.high %v389_v5, %v393_v6  ;;  %v441_v59 = vld [vmem:[#allocation5 + $0x978] sm:$0xff]  ;;  %v4426_v60 = vcombine.low %v476_v43, %v480_v45 }
 0x1bb   :  { %3110 = vmatpush1.bf16.msra.mxu1 %v4276_v7  ;;  %v4378_v7 = vcombine.low %v428_v56, %v432_v57  ;;  %v488_v56 = vld [vmem:[#allocation5 + $0xaf0] sm:$0xff]  ;;  %v437_v57 = vld [vmem:[#allocation5 + $0x958] sm:$0xff] }
 0x1bc   :  { %3111 = vmatprep.subr.bf16.mxu1 %v4285_v1  ;;  %v4387_v1 = vcombine.high %v436_v3, %v440_v4 }
 0x1bd   :  { %2952 = vmatpush1.bf16.msra.mxu0 %v4330_v13  ;;  %v401_v13 = vld [vmem:[#allocation5 + $0x838] sm:$0xff] }
 0x1be   :  { %2953 = vmatprep.subr.bf16.mxu0 %v4339_v15  ;;  %v4340_v15 = vcombine.low %v389_v5, %v393_v6  ;;  %v4349_v17 = vcombine.high %v397_v12, %v401_v13  ;;  %v449_v5 = vld [vmem:[#allocation5 + $0x9b8] sm:$0xff] }
 0x1bf   :  { %3112 = vmatpush1.bf16.msra.mxu1 %v4284_v14  ;;  %v4386_v14 = vcombine.low %v436_v3, %v440_v4  ;;  %v496_v3 = vld [vmem:[#allocation5 + $0xb30] sm:$0xff]  ;;  %v445_v4 = vld [vmem:[#allocation5 + $0x998] sm:$0xff] }
 0x1c0   :  { %3113 = vmatprep.subr.bf16.mxu1 %v4293_v16  ;;  %v4395_v16 = vcombine.high %v444_v10, %v448_v11 }
 0x1c1   :  { %2954 = vmatpush1.bf16.msra.mxu0 %v4338_v22  ;;  %v409_v22 = vld [vmem:[#allocation5 + $0x878] sm:$0xff] }
 0x1c2   :  { %2966 = vmatprep.subr.bf16.mxu0 %v4347_v23  ;;  %v4348_v23 = vcombine.low %v397_v12, %v401_v13  ;;  %v4357_v26 = vcombine.high %v405_v21, %v409_v22  ;;  %v457_v12 = vld [vmem:[#allocation5 + $0x9f8] sm:$0xff] }
 0x1c3   :  { %3114 = vmatpush1.bf16.msra.mxu1 %v4292_v24  ;;  %v4394_v24 = vcombine.low %v444_v10, %v448_v11  ;;  %v504_v10 = vld [vmem:[#allocation5 + $0xb70] sm:$0xff]  ;;  %v453_v11 = vld [vmem:[#allocation5 + $0x9d8] sm:$0xff] }
 0x1c4   :  { %3115 = vmatprep.subr.bf16.mxu1 %v4301_v25  ;;  %2956 = vmatmul.mubr.bf16.vlgmr.msra.gmra.mrb[4].mxu0 %v5189_v42  ;;  %v4403_v25 = vcombine.high %v452_v19, %v456_v20 }
 0x1c5   :  { %2967 = vmatpush1.bf16.msra.mxu0 %v4346_v31  ;;  %2998 = vmatprep.mubr.bf16.mxu0 %v5191_v44  ;;  %v417_v31 = vld [vmem:[#allocation5 + $0x8b8] sm:$0xff] }
 0x1c6   :  { %2968 = vmatprep.subr.bf16.mxu0 %v4355_v32  ;;  %v4356_v32 = vcombine.low %v405_v21, %v409_v22  ;;  %v4365_v34 = vcombine.high %v413_v30, %v417_v31  ;;  %v465_v21 = vld [vmem:[#allocation5 + $0xa38] sm:$0xff] }
 0x1c7   :  { %3116 = vmatpush1.bf16.msra.mxu1 %v4300_v28  ;;  %v4402_v28 = vcombine.low %v452_v19, %v456_v20  ;;  %v512_v19 = vld [vmem:[#allocation5 + $0xbb0] sm:$0xff]  ;;  %v461_v20 = vld [vmem:[#allocation5 + $0xa18] sm:$0xff] }
 0x1c8   :  { %3117 = vmatprep.subr.bf16.mxu1 %v4309_v33  ;;  %v4411_v33 = vcombine.high %v460_v27, %v464_v29 }
 0x1c9   :  { %2969 = vmatpush1.bf16.msra.mxu0 %v4354_v38  ;;  %v425_v38 = vld [vmem:[#allocation5 + $0x8f8] sm:$0xff] }
 0x1ca   :  { %2970 = vmatprep.subr.bf16.mxu0 %v4363_v40  ;;  %v4364_v40 = vcombine.low %v413_v30, %v417_v31  ;;  %v473_v30 = vld [vmem:[#allocation5 + $0xa78] sm:$0xff] }
 0x1cb   :  { %3118 = vmatpush1.bf16.msra.mxu1 %v4308_v39  ;;  %v4410_v39 = vcombine.low %v460_v27, %v464_v29  ;;  %v520_v27 = vld [vmem:[#allocation5 + $0xbf0] sm:$0xff]  ;;  %v469_v29 = vld [vmem:[#allocation5 + $0xa58] sm:$0xff] }
 0x1cc   :  { %3119 = vmatprep.subr.bf16.mxu1 %v4317_v41  ;;  %v4373_v41 = vcombine.high %v421_v37, %v425_v38 }
 0x1cd   :  { %2971 = vmatpush1.bf16.msra.mxu0 %v4362_v50  ;;  %v4418_v50 = vcombine.low %v468_v35, %v472_v36 }
 0x1ce   :  { %2972 = vmatprep.subr.bf16.mxu0 %v4371_v53  ;;  %v4381_v53 = vcombine.high %v429_v47, %v433_v48 }
 0x1cf   :  { %3120 = vmatpush1.bf16.msra.mxu1 %v4316_v52  ;;  %v4372_v52 = vcombine.low %v421_v37, %v425_v38  ;;  %v4420_v37 = vcombine.low %v469_v29, %v473_v30  ;;  %v4756_v38 = vld [vmem:[#allocation8 + $0x40] sm:$0xff]  }
 0x1d0   :  { %3121 = vmatprep.subr.bf16.mxu1 %v4325_v55  ;;  %v484_v55 = vld [vmem:[#allocation5 + $0xad0] sm:$0xff] }
 0x1d1   :  { %2973 = vmatpush1.bf16.msra.mxu0 %v4370_v61  ;;  %v4380_v61 = vcombine.low %v429_v47, %v433_v48  ;;  %v4434_v6 = vcombine.low %v484_v55, %v488_v56  ;;  %v493_v48 = vld [vmem:[#allocation5 + $0xb18] sm:$0xff] }
 0x1d2   :  { %2974 = vmatprep.subr.bf16.mxu0 %v4379_v63  ;;  %v4389_v63 = vcombine.high %v437_v57, %v441_v59 }
 0x1d3   :  { %3122 = vmatpush1.bf16.msra.mxu1 %v4324_v62  ;;  %v4435_v62 = vcombine.high %v484_v55, %v488_v56  ;;  %v501_v56 = vld [vmem:[#allocation5 + $0xb58] sm:$0xff] }
 0x1d4   :  { %3123 = vmatprep.subr.bf16.mxu1 %v4333_v2  ;;  %v492_v2 = vld [vmem:[#allocation5 + $0xb10] sm:$0xff] }
 0x1d5   :  { %2975 = vmatpush1.bf16.msra.mxu0 %v4378_v7  ;;  %v4388_v7 = vcombine.low %v437_v57, %v441_v59  ;;  %v4442_v13 = vcombine.low %v492_v2, %v496_v3  ;;  %v505_v57 = vld [vmem:[#allocation5 + $0xb78] sm:$0xff]  ;;  %v532_v59 = vlaneseq }
 0x1d6   :  { %2976 = vmatprep.subr.bf16.mxu0 %v4387_v1  ;;  %v4397_v1 = vcombine.high %v445_v4, %v449_v5 }
 0x1d7   :  { %3124 = vmatpush1.bf16.msra.mxu1 %v4332_v8  ;;  %v4443_v8 = vcombine.high %v492_v2, %v496_v3  ;;  %v509_v2 = vld [vmem:[#allocation5 + $0xb98] sm:$0xff] }
 0x1d8   :  { %3125 = vmatprep.subr.bf16.mxu1 %v4341_v9  ;;  %v500_v9 = vld [vmem:[#allocation5 + $0xb50] sm:$0xff]  ;;  %v513_v3 = vld [vmem:[#allocation5 + $0xbb8] sm:$0xff] }
 0x1d9   :  { %2977 = vmatpush1.bf16.msra.mxu0 %v4386_v14  ;;  %v4396_v14 = vcombine.low %v445_v4, %v449_v5  ;;  %v4450_v22 = vcombine.low %v500_v9, %v504_v10  ;;  %v5226_v4 = vshrl.u32 %v532_v59, 7  ;;  %v4763_v5 = vld [vmem:[#allocation8 + $0x18] sm:$0xff]  }
 0x1da   :  { %2978 = vmatprep.subr.bf16.mxu0 %v4395_v16  ;;  %v4405_v16 = vcombine.high %v453_v11, %v457_v12 }
 0x1db   :  { %3126 = vmatpush1.bf16.msra.mxu1 %v4340_v15  ;;  %v4451_v15 = vcombine.high %v500_v9, %v504_v10  ;;  %v517_v9 = vld [vmem:[#allocation5 + $0xbd8] sm:$0xff] }
 0x1dc   :  { %3138 = vmatprep.subr.bf16.mxu1 %v4349_v17  ;;  %v508_v17 = vld [vmem:[#allocation5 + $0xb90] sm:$0xff]  ;;  %v521_v10 = vld [vmem:[#allocation5 + $0xbf8] sm:$0xff] }
 0x1dd   :  { %2979 = vmatpush1.bf16.msra.mxu0 %v4394_v24  ;;  %v4404_v24 = vcombine.low %v453_v11, %v457_v12  ;;  %v4458_v31 = vcombine.low %v508_v17, %v512_v19  ;;  %v4765_v11 = vld [vmem:[#allocation8 + $0x20] sm:$0xff]   ;;  %v5229_v12 = vld [vmem:[#allocation7] sm:$0xff] }
 0x1de   :  { %3128 = vmatmul.mubr.bf16.vlgmr.msra.gmra.mrb[12].mxu1 %v5189_v42  ;;  %2980 = vmatprep.subr.bf16.mxu0 %v4403_v25  ;;  %v4419_v42 = vcombine.high %v468_v35, %v472_v36  ;;  %v4413_v25 = vcombine.high %v461_v20, %v465_v21  ;;  %v481_v35 = vld [vmem:[#allocation5 + $0xab8] sm:$0xff] }
 0x1df   :  { %3139 = vmatpush1.bf16.msra.mxu1 %v4348_v23  ;;  %3170 = vmatprep.mubr.bf16.mxu1 %v5191_v44  ;;  %v4427_v44 = vcombine.high %v476_v43, %v480_v45  ;;  %v4459_v23 = vcombine.high %v508_v17, %v512_v19  ;;  %v4758_v45 = vld [vmem:[#allocation8 + $0x48] sm:$0xff]   ;;  %v525_v19 = vld [vmem:[#allocation5 + $0xc18] sm:$0xff] }
 0x1e0   :  { %3140 = vmatprep.subr.bf16.mxu1 %v4357_v26  ;;  %v516_v26 = vld [vmem:[#allocation5 + $0xbd0] sm:$0xff] }
 0x1e1   :  { %2981 = vmatpush1.bf16.msra.mxu0 %v4402_v28  ;;  %v4412_v28 = vcombine.low %v461_v20, %v465_v21  ;;  %v4466_v36 = vcombine.low %v516_v26, %v520_v27  ;;  %v529_v20 = vld [vmem:[#allocation5 + $0xc38] sm:$0xff] }
 0x1e2   :  { %2982 = vmatprep.subr.bf16.mxu0 %v4411_v33  ;;  %v4421_v33 = vcombine.high %v469_v29, %v473_v30 }
 0x1e3   :  { %3141 = vmatpush1.bf16.msra.mxu1 %v4356_v32  ;;  %v4467_v32 = vcombine.high %v516_v26, %v520_v27  ;;  %v4477_v26 = vcombine.high %v525_v19, %v529_v20 }
 0x1e4   :  { %3142 = vmatprep.subr.bf16.mxu1 %v4365_v34  ;;  %v477_v34 = vld [vmem:[#allocation5 + $0xa98] sm:$0xff] }
 0x1e5   :  { %2983 = vmatpush1.bf16.msra.mxu0 %v4410_v39  ;;  %v4429_v39 = vcombine.high %v477_v34, %v481_v35  ;;  %v4428_v43 = vcombine.low %v477_v34, %v481_v35  ;;  %v4476_v35 = vcombine.low %v525_v19, %v529_v20 }
 0x1e6   :  { %2984 = vmatprep.subr.bf16.mxu0 %v4419_v42  ;;  %v489_v42 = vld [vmem:[#allocation5 + $0xaf8] sm:$0xff] }
 0x1e7   :  { %3143 = vmatpush1.bf16.msra.mxu1 %v4364_v40  ;;  %v485_v40 = vld [vmem:[#allocation5 + $0xad8] sm:$0xff] }
 0x1e8   :  { %3144 = vmatprep.subr.bf16.mxu1 %v4373_v41  ;;  %v4757_v41 = vld [vmem:[#allocation8] sm:$0xff]   ;;  %v4437_v47 = vcombine.high %v485_v40, %v489_v42 }
 0x1e9   :  { %2985 = vmatpush1.bf16.msra.mxu0 %v4418_v50  ;;  %v497_v50 = vld [vmem:[#allocation5 + $0xb38] sm:$0xff] }
 0x1ea   :  { %2986 = vmatprep.subr.bf16.mxu0 %v4427_v44  ;;  %v4436_v44 = vcombine.low %v485_v40, %v489_v42  ;;  %v4445_v55 = vcombine.high %v493_v48, %v497_v50 }
 0x1eb   :  { %3145 = vmatpush1.bf16.msra.mxu1 %v4372_v52  ;;  %v4759_v52 = vld [vmem:[#allocation8 + $0x8] sm:$0xff]  }
 0x1ec   :  { %3146 = vmatprep.subr.bf16.mxu1 %v4381_v53  ;;  %v4760_v53 = vld [vmem:[#allocation8 + $0x50] sm:$0xff]  }
 0x1ed   :  { %2987 = vmatpush1.bf16.msra.mxu0 %v4426_v60  ;;  %v4761_v60 = vld [vmem:[#allocation8 + $0x10] sm:$0xff]  }
 0x1ee   :  { %2988 = vmatprep.subr.bf16.mxu0 %v4435_v62  ;;  %v4762_v62 = vld [vmem:[#allocation8 + $0x58] sm:$0xff]  }
 0x1ef   :  { %3147 = vmatpush1.bf16.msra.mxu1 %v4380_v61  ;;  %v4444_v61 = vcombine.low %v493_v48, %v497_v50 }
 0x1f0   :  { %3148 = vmatprep.subr.bf16.mxu1 %v4389_v63  ;;  %v4453_v63 = vcombine.high %v501_v56, %v505_v57 }
 0x1f1   :  { %2989 = vmatpush1.bf16.msra.mxu0 %v4434_v6  ;;  %v4452_v6 = vcombine.low %v501_v56, %v505_v57  ;;  %v4792_v56 = vld [vmem:[#allocation8 + $0x150] sm:$0xff]   ;;  %v4774_v57 = vld [vmem:[#allocation8 + $0xc8] sm:$0xff]  }
 0x1f2   :  { %2990 = vmatprep.subr.bf16.mxu0 %v4443_v8  ;;  %v4461_v8 = vcombine.high %v509_v2, %v513_v3 }
 0x1f3   :  { %3149 = vmatpush1.bf16.msra.mxu1 %v4388_v7  ;;  %v4764_v7 = vld [vmem:[#allocation8 + $0x60] sm:$0xff]  }
 0x1f4   :  { %3150 = vmatprep.subr.bf16.mxu1 %v4397_v1  ;;  %v534_v1 = vsub.s32 0, %v5226_v4 }
 0x1f5   :  { %2991 = vmatpush1.bf16.msra.mxu0 %v4442_v13  ;;  %v538_v13 = vsub.s32 1, %v5226_v4 }
 0x1f6   :  { %2992 = vmatprep.subr.bf16.mxu0 %v4451_v15  ;;  %v4766_v15 = vld [vmem:[#allocation8 + $0x68] sm:$0xff]   ;;  %v535_v17 = vrot.slane %v5229_v12, %v534_v1 }
 0x1f7   :  { %3151 = vmatpush1.bf16.msra.mxu1 %v4396_v14  ;;  %v4460_v14 = vcombine.low %v509_v2, %v513_v3  ;;  %v539_v21 = vrot.slane %v5229_v12, %v538_v13  ;;  %v4775_v3 = vld [vmem:[#allocation8 + $0x88] sm:$0xff]  }
 0x1f8   :  { %3152 = vmatprep.subr.bf16.mxu1 %v4405_v16  ;;  %v4469_v16 = vcombine.high %v517_v9, %v521_v10 }
 0x1f9   :  { %2993 = vmatpush1.bf16.msra.mxu0 %v4450_v22  ;;  %v4767_v22 = vld [vmem:[#allocation8 + $0x28] sm:$0xff]  }
 0x1fa   :  { %2994 = vmatprep.subr.bf16.mxu0 %v4459_v23  ;;  %v4768_v23 = vld [vmem:[#allocation8 + $0x70] sm:$0xff]  }
 0x1fb   :  { %3153 = vmatpush1.bf16.msra.mxu1 %v4404_v24  ;;  %v4468_v24 = vcombine.low %v517_v9, %v521_v10 }
 0x1fc   :  { %3154 = vmatprep.subr.bf16.mxu1 %v4413_v25 }
 0x1fd   :  { %2995 = vmatpush1.bf16.msra.mxu0 %v4458_v31 }
 0x1fe   :  { %2996 = vmatprep.subr.bf16.mxu0 %v4467_v32 }
 0x1ff   :  { %3155 = vmatpush1.bf16.msra.mxu1 %v4412_v28  ;;  %v4769_v28 = vld [vmem:[#allocation8 + $0x30] sm:$0xff]  }
 0x200   :  { %3156 = vmatprep.subr.bf16.mxu1 %v4421_v33 }
 0x201   :  { %2997 = vmatpush1.bf16.msra.mxu0 %v4466_v36  ;;  %v4770_v36 = vld [vmem:[#allocation8 + $0x78] sm:$0xff]  }
 0x202   :  { %4556 = vmatprep.subr.bf16.mxu0 %v4756_v38 }
 0x203   :  { %3157 = vmatpush1.bf16.msra.mxu1 %v4420_v37 }
 0x204   :  { %3158 = vmatprep.subr.bf16.mxu1 %v4429_v39  ;;  %2999 = vmatmul.mubr.bf16.vlgmr.msra.gmra.mrb[4].mxu0 %v5197_v58  ;;  %v4772_v39 = vld [vmem:[#allocation8 + $0xc0] sm:$0xff]  }
 0x205   :  { %4557 = vmatpush3.bf16.msra.mxu0 %v4757_v41  ;;  %v4771_v41 = vld [vmem:[#allocation8 + $0x38] sm:$0xff]  }
 0x206   :  { %4558 = vmatprep.subr.bf16.mxu0 %v4758_v45  ;;  %v4788_v45 = vld [vmem:[#allocation8 + $0x140] sm:$0xff]  }
 0x207   :  { %3159 = vmatpush1.bf16.msra.mxu1 %v4428_v43 }
 0x208   :  { %3160 = vmatprep.subr.bf16.mxu1 %v4437_v47 }
 0x209   :  { %4559 = vmatpush3.bf16.msra.mxu0 %v4759_v52  ;;  %v4790_v52 = vld [vmem:[#allocation8 + $0x148] sm:$0xff]  }
 0x20a   :  { %4560 = vmatprep.subr.bf16.mxu0 %v4760_v53  ;;  %v4791_v53 = vld [vmem:[#allocation8 + $0x108] sm:$0xff]  }
 0x20b   :  { %3161 = vmatpush1.bf16.msra.mxu1 %v4436_v44 }
 0x20c   :  { %3162 = vmatprep.subr.bf16.mxu1 %v4445_v55  ;;  %v4773_v55 = vld [vmem:[#allocation8 + $0x80] sm:$0xff]  }
 0x20d   :  { %4561 = vmatpush3.bf16.msra.mxu0 %v4761_v60 }
 0x20e   :  { %4562 = vmatprep.subr.bf16.mxu0 %v4762_v62  ;;  %v4793_v62 = vld [vmem:[#allocation8 + $0x110] sm:$0xff]  }
 0x20f   :  { %3163 = vmatpush1.bf16.msra.mxu1 %v4444_v61 }
 0x210   :  { %3164 = vmatprep.subr.bf16.mxu1 %v4453_v63 }
 0x211   :  { %4563 = vmatpush3.bf16.msra.mxu0 %v4763_v5  ;;  %v4794_v5 = vld [vmem:[#allocation8 + $0x158] sm:$0xff]  }
 0x212   :  { %4564 = vmatprep.subr.bf16.mxu0 %v4764_v7 }
 0x213   :  { %3165 = vmatpush1.bf16.msra.mxu1 %v4452_v6 }
 0x214   :  { %3166 = vmatprep.subr.bf16.mxu1 %v4461_v8  ;;  %v4776_v8 = vld [vmem:[#allocation8 + $0xd0] sm:$0xff]  }
 0x215   :  { %4565 = vmatpush3.bf16.msra.mxu0 %v4765_v11  ;;  %v4795_v11 = vld [vmem:[#allocation8 + $0x118] sm:$0xff]  }
 0x216   :  { %4566 = vmatprep.subr.bf16.mxu0 %v4766_v15 }
 0x217   :  { %3167 = vmatpush1.bf16.msra.mxu1 %v4460_v14  ;;  %v2656_v25 = vpop.f32.mrb[0].mxu0  ;;  %v4777_v14 = vld [vmem:[#allocation8 + $0x90] sm:$0xff]  }
 0x218   :  { %3168 = vmatprep.subr.bf16.mxu1 %v4469_v16  ;;  %v4673_v27 = vadd.f32 %v2656_v25, %v535_v17  ;;  %v2658_v29 = vpop.f32.mrb[1].mxu0  ;;  %v4778_v16 = vld [vmem:[#allocation8 + $0xd8] sm:$0xff]  }
 0x219   :  { %v4675_v30 = vadd.f32 %v2658_v29, %v539_v21  ;;  %v2660_v31 = vpop.f32.mrb[2].mxu0  ;;  %4567 = vmatpush3.bf16.msra.mxu0 %v4767_v22  ;;  %v4797_v22 = vld [vmem:[#allocation8 + $0x120] sm:$0xff]   ;;  %v4782_v29 = vld [vmem:[#allocation8 + $0xe8] sm:$0xff]  }
 0x21a   :  { %v4674_v32 = vadd.f32 %v4673_v27, %v5206_v46  ;;  %v4677_v33 = vadd.f32 %v2660_v31, %v535_v17  ;;  %v2662_v34 = vpop.f32.mrb[3].mxu0  ;;  %4568 = vmatprep.subr.bf16.mxu0 %v4768_v23  ;;  %v4796_v17 = vld [vmem:[#allocation8 + $0x160] sm:$0xff]   ;;  %v4779_v23 = vld [vmem:[#allocation8 + $0x98] sm:$0xff]   ;;  %v4784_v31 = vld [vmem:[#allocation8 + $0xf0] sm:$0xff]  }
 0x21b   :  { %3169 = vmatpush1.bf16.msra.mxu1 %v4468_v24  ;;  %v4676_v37 = vadd.f32 %v4675_v30, %v5208_v49  ;;  %v4679_v38 = vadd.f32 %v2662_v34, %v539_v21  ;;  %v4781_v27 = vld [vmem:[#allocation8 + $0xa0] sm:$0xff]   ;;  %v4783_v30 = vld [vmem:[#allocation8 + $0xa8] sm:$0xff]  }
 0x21c   :  { %3181 = vmatprep.subr.bf16.mxu1 %v4477_v26  ;;  %v4678_v40 = vadd.f32 %v4677_v33, %v5212_v51  ;;  %v3224_v46 = vmax.f32 %v4674_v32, 0.0  ;;  %v542_v51 = vsub.s32 2, %v5226_v4  ;;  %v4780_v26 = vld [vmem:[#allocation8 + $0xe0] sm:$0xff]   ;;  %v4786_v32 = vld [vmem:[#allocation8 + $0xf8] sm:$0xff]   ;;  %v4798_v34 = vld [vmem:[#allocation8 + $0x168] sm:$0xff]  }
 0x21d   :  { %v4680_v42 = vadd.f32 %v4679_v38, %v5214_v54  ;;  %4569 = vmatpush3.bf16.msra.mxu0 %v4769_v28  ;;  %v3225_v47 = vmax.f32 %v4676_v37, 0.0  ;;  %v4789_v54 = vld [vmem:[#allocation8 + $0x100] sm:$0xff]   ;;  %v4785_v28 = vld [vmem:[#allocation8 + $0xb0] sm:$0xff]   ;;  %v4787_v33 = vld [vmem:[#allocation8 + $0xb8] sm:$0xff]  }
 0x21e   :  { %3171 = vmatmul.mubr.bf16.vlgmr.msra.gmra.mrb[12].mxu1 %v5197_v58  ;;  %v3232_v43 = vmax.f32 %v4678_v40, 0.0  ;;  %4570 = vmatprep.subr.bf16.mxu0 %v4770_v36  ;;  %v546_v58 = vsub.s32 3, %v5226_v4  ;;  %v543_v44 = vrot.slane %v5229_v12, %v542_v51  ;;  %v4800_v36 = vld [vmem:[#allocation8 + $0x170] sm:$0xff]   ;;  %v4802_v38 = vld [vmem:[#allocation8 + $0x178] sm:$0xff]   ;;  %v4804_v40 = vld [vmem:[#allocation8 + $0x1c0] sm:$0xff]  }
 0x21f   :  { %3182 = vmatpush1.bf16.msra.mxu1 %v4476_v35  ;;  %v3233_v48 = vmax.f32 %v4680_v42, 0.0  ;;  %3213 = vmatprep.mubr.bf16.mxu1 %v5035_v0  ;;  %v4799_v35 = vld [vmem:[#allocation8 + $0x128] sm:$0xff]   ;;  %v4801_v37 = vld [vmem:[#allocation8 + $0x130] sm:$0xff]   ;;  %v4805_v42 = vld [vmem:[#allocation8 + $0x180] sm:$0xff]  }
 0x220   :  { %4578 = vmatprep.subr.bf16.mxu1 %v4772_v39  ;;  %v3240_v49 = vpack.c.bf16 %v3232_v43, %v3224_v46  ;;  %v547_v0 = vrot.slane %v5229_v12, %v546_v58  ;;  %v4803_v39 = vld [vmem:[#allocation8 + $0x138] sm:$0xff]   ;;  %v4807_v46 = vld [vmem:[#allocation8 + $0x188] sm:$0xff]   ;;  %v4808_v43 = vld [vmem:[#allocation8 + $0x1d0] sm:$0xff]  }
 0x221   :  { %4571 = vmatpush3.bf16.msra.mxu0 %v4771_v41  ;;  %v3241_v50 = vpack.c.bf16 %v3233_v48, %v3225_v47  ;;  %v4806_v41 = vld [vmem:[#allocation8 + $0x1c8] sm:$0xff]   ;;  %v4810_v47 = vld [vmem:[#allocation8 + $0x1d8] sm:$0xff]   ;;  %v4816_v58 = vld [vmem:[#allocation8 + $0x1f0] sm:$0xff]  }
 0x222   :  { %4600 = vmatprep.subr.bf16.mxu0 %v4788_v45  ;;  %v4809_v45 = vld [vmem:[#allocation8 + $0x190] sm:$0xff]   ;;  %v4811_v48 = vld [vmem:[#allocation8 + $0x198] sm:$0xff]   ;;  %v4814_v51 = vld [vmem:[#allocation8 + $0x1e8] sm:$0xff]  }
 0x223   :  { %3799 = vmatprep.mubr.bf16.mxu0 %v3241_v50  ;;  %v4813_v50 = vld [vmem:[#allocation8 + $0x1a0] sm:$0xff]  }
 0x224   :  { %3800 = vmatmul.mubr.bf16.vlgmr.msra.gmra.mrb[8].mxu0 %v3240_v49  ;;  %v4812_v49 = vld [vmem:[#allocation8 + $0x1e0] sm:$0xff]  }
 0x225   :  { %4601 = vmatpush3.bf16.msra.mxu0 %v4789_v54  ;;  %v4815_v54 = vld [vmem:[#allocation8 + $0x1a8] sm:$0xff]  }
 0x226   :  { %4602 = vmatprep.subr.bf16.mxu0 %v4790_v52  ;;  %v4817_v52 = vld [vmem:[#allocation8 + $0x1b0] sm:$0xff]  }
 0x229   :  { %v2871_v59 = vpop.f32.mrb[4].mxu1  ;;  %4603 = vmatpush3.bf16.msra.mxu0 %v4791_v53  ;;  %v4819_v53 = vld [vmem:[#allocation8 + $0x1b8] sm:$0xff]  }
 0x22a   :  { %v4681_v60 = vadd.f32 %v2871_v59, %v543_v44  ;;  %4481 = vmatmul.mubr.msk.bf16.vlgmr.msra.gmra.mrb[12].mxu1 %vm2532_vm0, %v5173_v18  ;;  %v2873_v61 = vpop.f32.mrb[5].mxu1  ;;  %4604 = vmatprep.subr.bf16.mxu0 %v4792_v56 }
 0x22b   :  { %4579 = vmatpush3.bf16.msra.mxu1 %v4773_v55  ;;  %v4682_v63 = vadd.f32 %v2873_v61, %v547_v0  ;;  %v2875_v2 = vpop.f32.mrb[6].mxu1  ;;  %v550_v55 = vsub.s32 4, %v5226_v4 }
 0x22c   :  { %v4683_v6 = vadd.f32 %v2875_v2, %v543_v44  ;;  %v2877_v7 = vpop.f32.mrb[7].mxu1  ;;  %4580 = vmatprep.subr.bf16.mxu1 %v4774_v57  ;;  %v3226_v9 = vmax.f32 %v4681_v60, 0.0  ;;  %v4818_v44 = vld [vmem:[#allocation8 + $0x1f8] sm:$0xff]  }
 0x22d   :  { %v4684_v1 = vadd.f32 %v2877_v7, %v547_v0  ;;  %4605 = vmatpush3.bf16.msra.mxu0 %v4793_v62  ;;  %v3227_v13 = vmax.f32 %v4682_v63, 0.0  ;;  %v554_v0 = vsub.s32 5, %v5226_v4  ;;  %v551_v56 = vrot.slane %v5229_v12, %v550_v55  ;;  %v4826_v55 = vld [vmem:[#allocation11 + $0x30] sm:$0xff]  }
 0x22e   :  { %v3234_v10 = vmax.f32 %v4683_v6, 0.0  ;;  %4606 = vmatprep.subr.bf16.mxu0 %v4794_v5 }
 0x22f   :  { %v3235_v18 = vmax.f32 %v4684_v1, 0.0  ;;  %4581 = vmatpush3.bf16.msra.mxu1 %v4775_v3  ;;  %v555_v57 = vrot.slane %v5229_v12, %v554_v0  ;;  %v4827_v0 = vld [vmem:[#allocation11 + $0x38] sm:$0xff]  }
 0x230   :  { %v3242_v15 = vpack.c.bf16 %v3234_v10, %v3226_v9  ;;  %4582 = vmatprep.subr.bf16.mxu1 %v4776_v8 }
 0x231   :  { %v3243_v19 = vpack.c.bf16 %v3235_v18, %v3227_v13  ;;  %v5246_v20 = vpop.f32.mrb[8].mxu1  ;;  %4607 = vmatpush3.bf16.msra.mxu0 %v4795_v11 }
 0x232   :  { %v5248_v21 = vpop.f32.mrb[9].mxu1  ;;  %4608 = vmatprep.subr.bf16.mxu0 %v4796_v17 }
 0x233   :  { %4583 = vmatpush3.bf16.msra.mxu1 %v4777_v14  ;;  %v5250_v24 = vpop.f32.mrb[10].mxu1  ;;  %3840 = vmatprep.mubr.bf16.mxu1 %v3243_v19 }
 0x234   :  { %v5252_v25 = vpop.f32.mrb[11].mxu1  ;;  %4584 = vmatprep.subr.bf16.mxu1 %v4778_v16  ;;  %v562_v16 = vsub.s32 7, %v5226_v4 }
 0x235   :  { %4609 = vmatpush3.bf16.msra.mxu0 %v4797_v22 }
 0x236   :  { %4610 = vmatprep.subr.bf16.mxu0 %v4798_v34 }
 0x237   :  { %4585 = vmatpush3.bf16.msra.mxu1 %v4779_v23  ;;  %v563_v23 = vrot.slane %v5229_v12, %v562_v16 }
 0x238   :  { %4586 = vmatprep.subr.bf16.mxu1 %v4780_v26 }
 0x239   :  { %4611 = vmatpush3.bf16.msra.mxu0 %v4799_v35 }
 0x23a   :  { %4612 = vmatprep.subr.bf16.mxu0 %v4800_v36 }
 0x23b   :  { %4587 = vmatpush3.bf16.msra.mxu1 %v4781_v27 }
 0x23c   :  { %4588 = vmatprep.subr.bf16.mxu1 %v4782_v29 }
 0x23d   :  { %4613 = vmatpush3.bf16.msra.mxu0 %v4801_v37 }
 0x23e   :  { %4614 = vmatprep.subr.bf16.mxu0 %v4802_v38 }
 0x23f   :  { %4589 = vmatpush3.bf16.msra.mxu1 %v4783_v30 }
 0x240   :  { %4590 = vmatprep.subr.bf16.mxu1 %v4784_v31 }
 0x241   :  { %4615 = vmatpush3.bf16.msra.mxu0 %v4803_v39  ;;  %v4482_v39 = vld [vmem:[#allocation10] ss:$0 sm:$0xff] }
 0x243   :  { %4591 = vmatpush3.bf16.msra.mxu1 %v4785_v28 }
 0x244   :  { %4592 = vmatprep.subr.bf16.mxu1 %v4786_v32 }
 0x247   :  { %4593 = vmatpush3.bf16.msra.mxu1 %v4787_v33 }
 0x248   :  { %4622 = vmatprep.subr.bf16.mxu1 %v4804_v40 }
 0x24a   :  { %3841 = vmatmul.mubr.bf16.vlgmr.msra.gmra.mrb[16].mxu1 %v3242_v15  ;;  %v558_v15 = vsub.s32 6, %v5226_v4 }
 0x24b   :  { %4623 = vmatpush3.bf16.msra.mxu1 %v4805_v42 }
 0x24c   :  { %4624 = vmatprep.subr.bf16.mxu1 %v4806_v41  ;;  %v559_v22 = vrot.slane %v5229_v12, %v558_v15 }
 0x24f   :  { %4625 = vmatpush3.bf16.msra.mxu1 %v4807_v46 }
 0x250   :  { %4626 = vmatprep.subr.bf16.mxu1 %v4808_v43 }
 0x253   :  { %4627 = vmatpush3.bf16.msra.mxu1 %v4809_v45 }
 0x254   :  { %4628 = vmatprep.subr.bf16.mxu1 %v4810_v47 }
 0x257   :  { %4629 = vmatpush3.bf16.msra.mxu1 %v4811_v48 }
 0x258   :  { %4630 = vmatprep.subr.bf16.mxu1 %v4812_v49 }
 0x25b   :  { %4631 = vmatpush3.bf16.msra.mxu1 %v4813_v50  ;;  %v4820_v50 = vld [vmem:[#allocation11] sm:$0xff]  }
 0x25c   :  { %4632 = vmatprep.subr.bf16.mxu1 %v4814_v51  ;;  %v5036_v51 = vmov 0.0  }
 0x25d   :  { %4653 = vmatprep.subr.bf16.mxu0 %v5036_v51 }
 0x25f   :  { %4633 = vmatpush3.bf16.msra.mxu1 %v4815_v54  ;;  %v4821_v54 = vld [vmem:[#allocation11 + $0x8] sm:$0xff]  }
 0x260   :  { %4634 = vmatprep.subr.bf16.mxu1 %v4816_v58  ;;  %v4822_v58 = vld [vmem:[#allocation11 + $0x10] sm:$0xff]  }
 0x263   :  { %4635 = vmatpush3.bf16.msra.mxu1 %v4817_v52  ;;  %v4823_v52 = vld [vmem:[#allocation11 + $0x18] sm:$0xff]  }
 0x264   :  { %4636 = vmatprep.subr.bf16.mxu1 %v4818_v44  ;;  %v4824_v44 = vld [vmem:[#allocation11 + $0x20] sm:$0xff]  }
 0x267   :  { %4637 = vmatpush3.bf16.msra.mxu1 %v4819_v53  ;;  %v4825_v53 = vld [vmem:[#allocation11 + $0x28] sm:$0xff]  }
 0x2d7   :  { %v3000_v59 = vpop.f32.mrb[4].mxu0 }
 0x2d8   :  { %v4685_v60 = vadd.f32 %v3000_v59, %v551_v56  ;;  %v3002_v61 = vpop.f32.mrb[5].mxu0 }
 0x2d9   :  { %v4687_v62 = vadd.f32 %v3002_v61, %v555_v57  ;;  %v3004_v63 = vpop.f32.mrb[6].mxu0 }
 0x2da   :  { %v4686_v2 = vadd.f32 %v4685_v60, %v5246_v20  ;;  %v4689_v3 = vadd.f32 %v3004_v63, %v551_v56  ;;  %v3006_v5 = vpop.f32.mrb[7].mxu0 }
 0x2db   :  { %v4688_v6 = vadd.f32 %v4687_v62, %v5248_v21  ;;  %v4691_v7 = vadd.f32 %v3006_v5, %v555_v57 }
 0x2dc   :  { %v4690_v8 = vadd.f32 %v4689_v3, %v5250_v24  ;;  %v3228_v9 = vmax.f32 %v4686_v2, 0.0 }
 0x2dd   :  { %v4692_v1 = vadd.f32 %v4691_v7, %v5252_v25  ;;  %v3229_v11 = vmax.f32 %v4688_v6, 0.0 }
 0x2de   :  { %v3236_v10 = vmax.f32 %v4690_v8, 0.0 }
 0x2df   :  { %v3237_v13 = vmax.f32 %v4692_v1, 0.0 }
 0x2e0   :  { %v3244_v18 = vpack.c.bf16 %v3236_v10, %v3228_v9 }
 0x2e1   :  { %v3245_v14 = vpack.c.bf16 %v3237_v13, %v3229_v11 }
 0x2e3   :  { %3881 = vmatprep.mubr.bf16.mxu0 %v3245_v14  ;;  %v4547_v14 = vld [vmem:[#allocation13] ss:$0 sm:$0xff] }
 0x2e4   :  { %3882 = vmatmul.mubr.bf16.vlgmr.msra.gmra.mrb[12].mxu0 %v3244_v18 }
 0x2e5   :  { %4654 = vmatpush3.bf16.msra.mxu0 %v4820_v50  ;;  %4669 = vmatprep.mubr.msk.bf16.mxu0 %vm5037_vm1, %v5036_v51 }
 0x2e6   :  { %4655 = vmatprep.subr.bf16.mxu0 %v5036_v51 }
 0x2e9   :  { %4656 = vmatpush3.bf16.msra.mxu0 %v4821_v54 }
 0x2ea   :  { %4657 = vmatprep.subr.bf16.mxu0 %v5036_v51 }
 0x2ed   :  { %4658 = vmatpush3.bf16.msra.mxu0 %v4822_v58 }
 0x2ee   :  { %4659 = vmatprep.subr.bf16.mxu0 %v5036_v51 }
 0x2f1   :  { %4660 = vmatpush3.bf16.msra.mxu0 %v4823_v52 }
 0x2f2   :  { %4661 = vmatprep.subr.bf16.mxu0 %v5036_v51 }
 0x2f5   :  { %4662 = vmatpush3.bf16.msra.mxu0 %v4824_v44 }
 0x2f6   :  { %4663 = vmatprep.subr.bf16.mxu0 %v5036_v51 }
 0x2f7   :  { %v4572_v17 = vpop.f32.mrb[8].mxu0 }
 0x2f8   :  { %v4573_v19 = vpop.f32.mrb[9].mxu0 }
 0x2f9   :  { %v4574_v20 = vadd.f32 %v4573_v19, %v4572_v17  ;;  %v4575_v21 = vpop.f32.mrb[10].mxu0  ;;  %4664 = vmatpush3.bf16.msra.mxu0 %v4825_v53 }
 0x2fa   :  { %v4576_v24 = vpop.f32.mrb[11].mxu0  ;;  %4665 = vmatprep.subr.bf16.mxu0 %v5036_v51 }
 0x2fb   :  { %v4577_v25 = vadd.f32 %v4576_v24, %v4575_v21  ;;  %v3802_v42 = vadd.f32 %v4574_v20, %v4482_v39 }
 0x2fd   :  { %v3215_v26 = vpop.f32.mrb[12].mxu1  ;;  %v3805_v45 = vadd.f32 %v4577_v25, %v4482_v39  ;;  %4666 = vmatpush3.bf16.msra.mxu0 %v4826_v55 }
 0x2fe   :  { %v4693_v27 = vadd.f32 %v3215_v26, %v559_v22  ;;  %v3217_v29 = vpop.f32.mrb[13].mxu1  ;;  %4667 = vmatprep.subr.bf16.mxu0 %v5036_v51 }
 0x2ff   :  { %v4694_v30 = vadd.f32 %v3217_v29, %v563_v23  ;;  %v3219_v31 = vpop.f32.mrb[14].mxu1 }
 0x300   :  { %v4695_v28 = vadd.f32 %v3219_v31, %v559_v22  ;;  %v3221_v32 = vpop.f32.mrb[15].mxu1  ;;  %v3230_v34 = vmax.f32 %v4693_v27, 0.0 }
 0x301   :  { %v4696_v33 = vadd.f32 %v3221_v32, %v563_v23  ;;  %v3231_v35 = vmax.f32 %v4694_v30, 0.0  ;;  %4668 = vmatpush3.bf16.msra.mxu0 %v4827_v0 }
 0x302   :  { %v3238_v4 = vmax.f32 %v4695_v28, 0.0 }
 0x303   :  { %v3239_v36 = vmax.f32 %v4696_v33, 0.0 }
 0x304   :  { %v3246_v37 = vpack.c.bf16 %v3238_v4, %v3230_v34 }
 0x305   :  { %v3247_v38 = vpack.c.bf16 %v3239_v36, %v3231_v35 }
 0x307   :  { %3922 = vmatprep.mubr.bf16.mxu1 %v3247_v38 }
 0x308   :  { %3923 = vmatmul.mubr.bf16.vlgmr.msra.gmra.mrb[20].mxu1 %v3246_v37 }
 0x31d   :  { %v4594_v40 = vpop.f32.mrb[16].mxu1 }
 0x31e   :  { %v4595_v12 = vpop.f32.mrb[17].mxu1 }
 0x31f   :  { %v4596_v41 = vadd.f32 %v4595_v12, %v4594_v40  ;;  %v4597_v46 = vpop.f32.mrb[18].mxu1 }
 0x320   :  { %v4598_v43 = vpop.f32.mrb[19].mxu1 }
 0x321   :  { %v3843_v47 = vadd.f32 %v4596_v41, %v3802_v42  ;;  %v4599_v48 = vadd.f32 %v4598_v43, %v4597_v46 }
 0x323   :  { %v3846_v49 = vadd.f32 %v4599_v48, %v3805_v45 }
 0x3b7   :  { %v4616_v56 = vpop.f32.mrb[12].mxu0 }
 0x3b8   :  { %v4617_v57 = vpop.f32.mrb[13].mxu0 }
 0x3b9   :  { %v4618_v59 = vadd.f32 %v4617_v57, %v4616_v56  ;;  %v4619_v60 = vpop.f32.mrb[14].mxu0 }
 0x3ba   :  { %v4620_v61 = vpop.f32.mrb[15].mxu0 }
 0x3bb   :  { %v3884_v62 = vadd.f32 %v4618_v59, %v3843_v47  ;;  %v4621_v63 = vadd.f32 %v4620_v61, %v4619_v60 }
 0x3bd   :  { %v3887_v2 = vadd.f32 %v4621_v63, %v3846_v49 }
 0x3db   :  { %v4638_v3 = vpop.f32.mrb[20].mxu1 }
 0x3dc   :  { %v4639_v5 = vpop.f32.mrb[21].mxu1 }
 0x3dd   :  { %v4640_v6 = vadd.f32 %v4639_v5, %v4638_v3  ;;  %v4641_v7 = vpop.f32.mrb[22].mxu1 }
 0x3de   :  { %v4642_v8 = vpop.f32.mrb[23].mxu1 }
 0x3df   :  { %v3925_v1 = vadd.f32 %v4640_v6, %v3884_v62  ;;  %v4643_v9 = vadd.f32 %v4642_v8, %v4641_v7 }
 0x3e1   :  { %v3928_v10 = vadd.f32 %v4643_v9, %v3887_v2  ;;  %v3931_v11 = vmax.f32 %v3925_v1, 0.0 }
 0x3e3   :  { %v3932_v13 = vmax.f32 %v3928_v10, 0.0 }
 0x3e5   :  { %v3933_v18 = vpack.c.bf16 %v3932_v13, %v3931_v11 }
 0x3e7   :  { %4670 = vmatmul.mubr.bf16.vlgmr.msra.gmra.mrb[16].mxu0 %v3933_v18 }
 0x4ba   :  { %v4039_v15 = vpop.f32.mrb[16].mxu0 }
 0x4bb   :  { %v4040_v16 = vadd.f32 %v4547_v14, %v4039_v15  ;;  %v4671_v17 = vpop.f32.mrb[17].mxu0 }
 0x4bc   :  { %v4042_v19 = vpop.f32.mrb[18].mxu0 }
 0x4bd   :  { %4046 = vmax.xlane.f32.xlu0 %v4040_v16  ;;  %v4672_v20 = vpop.f32.mrb[19].mxu0  ;;  %v4043_v21 = vadd.f32 %v4547_v14, %v4042_v19 }
 0x4c1   :  { %4048 = vmax.xlane.f32.xlu0 %v4043_v21 }
 0x54a   :  { %v4047_v22 = vpop.xlane.xlu0 %4046 }
 0x54b   :  { %v4050_v24 = vsub.f32 %v4040_v16, %v4047_v22 }
 0x54d   :  { %v4052_v23 = vmul.f32 1.442695, %v4050_v24 }
 0x54e   :  { %v4049_v25 = vpop.xlane.xlu0 %4048 }
 0x54f   :  { %4828 = vpow2.f32 %v4052_v23  ;;  %v4051_v26 = vsub.f32 %v4043_v21, %v4049_v25 }
 0x551   :  { %v4054_v27 = vmul.f32 1.442695, %v4051_v26 }
 0x553   :  { %4830 = vpow2.f32 %v4054_v27 }
 0x559   :  { %v4829_v29 = vpop.eup %4828 }
 0x55a   :  { %4056 = vadd.xlane.f32.xlu1 %v4829_v29 }
 0x55d   :  { %v4831_v30 = vpop.eup %4830 }
 0x55e   :  { %4058 = vadd.xlane.f32.xlu1 %v4831_v30 }
 0x5e7   :  { %v4057_v31 = vpop.xlane.xlu1 %4056 }
 0x5e8   :  { %4832 = vrcp.f32 %v4057_v31 }
 0x5eb   :  { %v4059_v28 = vpop.xlane.xlu1 %4058 }
 0x5ec   :  { %4834 = vrcp.f32 %v4059_v28 }
 0x5f2   :  { %v4833_v32 = vpop.eup %4832 }
 0x5f3   :  { %v4062_v33 = vmul.f32 %v4833_v32, %v4829_v29 }
 0x5f5   :  { %4064 = vst [vmem:[#allocation14] sm:$0xff] %v4062_v33 }
 0x5f6   :  { %v4835_v34 = vpop.eup %4834 }
 0x5f7   :  { %v4063_v4 = vmul.f32 %v4835_v34, %v4831_v30 }
 0x5f9   :  { %4065 = vst [vmem:[#allocation14 + $0x8] sm:$0xff] %v4063_v4 }
 0x5fa   :  { %5001 = shalt.err (!%p4998_p4)
}
 0x5fb   :  { %s5002_s16 = scalar_lea.hbm %s5285_s7, 256 }
 0x5fc   :  { %p5003_p5 = scmp.ne.s32.totalorder %s5285_s7, %s5002_s16  ;;  %p5006_p6 = scmp.lt.u32.totalorder %s5002_s16, %s5285_s7 }
 0x5fe   :  { %p5008_p7 = pnand %p5006_p6, %p5003_p5 }
 0x600   :  { %5011 = shalt.err (!%p5008_p7)
}
 0x601   :  { %s5039_s21 = smov 128   ;;  %s5040_s22 = smov 8  }
 0x602   :  { %4077 = dma.vmem_to_hbm [thread:$0]  %s4072_s15, 256, %s5285_s7, [#allocation4], %s5039_s21, %s5039_s21, %s5040_s22  }
 0x603   :  { %5020 = dma.done.wait [#allocation4], 256  }
 0x604   :  { %5021 = vsyncadd [#allocation4], 4294967040 }
 0x605   :  { %4081 = vsyncpa [#allocation3], 1 }
 0x606   :  { %4082 = vsyncpa [#allocation6], 1 }
 0x607   :  { %4083 = vsyncpa [#allocation9], 1 }
 0x608   :  { %4084 = vsyncpa [#allocation12], 1 }
 0x609   :  { %4085 = vsyncpa [#allocation4], 1 }

</bundles_post_ra>
